<compile_context>
chip_gen: v5e
topology: v5e:2x2
jax: 0.10.0
libtpu: 0.0.40
codegen_flags: <defaults>
</compile_context>

<pallas_src>
import functools

import jax
import jax.numpy as jnp
from jax.experimental import pallas as pl
from jax.experimental.pallas import tpu as pltpu


def attn_lora_kernel(x_ref, wfused_ref, wbq_ref, wbv_ref, wproj_ref, bproj_ref,
                     o_ref, ctx_ref, *, num_heads, scale):
    Bt, N, C = x_ref.shape
    hd = C // num_heads
    r = wbq_ref.shape[0]
    M = Bt * N

    # ---- fused projection: x @ [Wqkv^T | WAq^T | WAv^T]  (one MXU pass over x)
    x = x_ref[...].reshape(M, C).astype(jnp.bfloat16)
    fused = jnp.dot(x, wfused_ref[...],
                    preferred_element_type=jnp.float32)          # (M, 3C + 2r)

    q = fused[:, 0 * C:1 * C]
    k = fused[:, 1 * C:2 * C]
    v = fused[:, 2 * C:3 * C]
    aq = fused[:, 3 * C:3 * C + r]                                # LoRA low-rank acts
    av = fused[:, 3 * C + r:3 * C + 2 * r]

    # small (M, r) @ (r, C) LoRA "B" matmuls
    dq = jnp.dot(aq.astype(jnp.bfloat16), wbq_ref[...],
                 preferred_element_type=jnp.float32)              # (M, C)
    dv = jnp.dot(av.astype(jnp.bfloat16), wbv_ref[...],
                 preferred_element_type=jnp.float32)              # (M, C)

    # fold the softmax scale into q (N*hd ops instead of N*N on the scores)
    q = ((q + dq) * scale).reshape(Bt, N, C).astype(jnp.bfloat16)
    k = k.reshape(Bt, N, C).astype(jnp.bfloat16)
    v = (v + dv).reshape(Bt, N, C).astype(jnp.bfloat16)

    # ---- per-head attention, batched over the Bt batch elements.
    # Each head's (Bt, N, hd) output is stored directly into the ctx scratch at
    # its static lane offset (no list + concatenate).
    # TODO(synk): for large sequence lengths switch to an online (flash-style)
    # softmax over K/V tiles instead of materializing the full (N, N) scores.
    for h in range(num_heads):
        sl = slice(h * hd, (h + 1) * hd)
        qh = q[:, :, sl]
        kh = k[:, :, sl]
        vh = v[:, :, sl]
        s = jnp.einsum('bqd,bkd->bqk', qh, kh,
                       preferred_element_type=jnp.float32)        # (Bt, N, N)
        s = s - jnp.max(s, axis=-1, keepdims=True)
        p = jnp.exp(s)
        p = p * pl.reciprocal(jnp.sum(p, axis=-1, keepdims=True), approx=True)
        ctx_h = jnp.einsum('bqk,bkd->bqd', p.astype(jnp.bfloat16), vh,
                           preferred_element_type=jnp.float32)    # (Bt, N, hd)
        ctx_ref[:, :, sl] = ctx_h.astype(ctx_ref.dtype)

    # ---- output projection
    ctx = ctx_ref[...].reshape(M, C)                              # bf16
    out = jnp.dot(ctx, wproj_ref[...], preferred_element_type=jnp.float32)
    out = out + bproj_ref[...]                                    # (M, C) + (1, C)
    o_ref[...] = out.reshape(Bt, N, C).astype(o_ref.dtype)


def attention_lora_forward(x, wqkv_t, waq_t, wbq_t, wav_t, wbv_t, wproj_t, bproj,
                           *, num_heads, block_b=None):
    """x: (B, N, C); all weights pre-transposed to (in_features, out_features)."""
    B, N, C = x.shape
    hd = C // num_heads
    scale = hd ** (-0.5)

    # Fuse qkv + LoRA-A projections into one (C, 3C + 2r) matrix; cast weights
    # to bf16 for the MXU (accumulation stays f32 inside the kernel).
    w_fused = jnp.concatenate([wqkv_t, waq_t, wav_t], axis=-1).astype(jnp.bfloat16)
    wbq = wbq_t.astype(jnp.bfloat16)
    wbv = wbv_t.astype(jnp.bfloat16)
    wproj = wproj_t.astype(jnp.bfloat16)
    bproj2 = bproj.reshape(1, C).astype(jnp.float32)

    # Pack several batch elements per grid step so the projection matmuls see
    # roughly >= 256 rows (Bt must divide B; last two block dims stay full-extent
    # so the (8, 128) tiling constraint is satisfied).
    if block_b is None:
        block_b = max(1, min(B, pl.cdiv(256, N)))
        while B % block_b:
            block_b -= 1
    Bt = block_b
    grid = (B // Bt,)

    kernel = functools.partial(attn_lora_kernel, num_heads=num_heads, scale=scale)

    def full2d(a):
        return pl.BlockSpec(a.shape, lambda b: (0, 0))

    # NOTE: at realistic C (e.g. 768) raise vmem_limit_bytes and/or single-buffer
    # the grid-invariant weight specs (pipeline_mode=pl.Buffered(1)); at these
    # demo sizes the default scoped VMEM limit is ample, so we keep defaults.
    return pl.pallas_call(
        kernel,
        out_shape=jax.ShapeDtypeStruct((B, N, C), x.dtype),
        grid=grid,
        in_specs=[
            pl.BlockSpec((Bt, N, C), lambda b: (b, 0, 0)),   # x, Bt batch elements
            full2d(w_fused),                                 # [Wqkv^T | WAq^T | WAv^T]
            full2d(wbq),                                     # W_Bq^T  (r, C)
            full2d(wbv),                                     # W_Bv^T  (r, C)
            full2d(wproj),                                   # W_proj^T (C, C)
            full2d(bproj2),                                  # b_proj   (1, C)
        ],
        out_specs=pl.BlockSpec((Bt, N, C), lambda b: (b, 0, 0)),
        scratch_shapes=[pltpu.VMEM((Bt, N, C), jnp.bfloat16)],   # ctx buffer
        compiler_params=pltpu.CompilerParams(dimension_semantics=("parallel",)),
    )(x, w_fused, wbq, wbv, wproj, bproj2)


def reference_forward(x, Wqkv, WAq, WBq, WAv, WBv, Wproj, bproj, *, num_heads):
    """Pure-JAX (f32) replica of the PyTorch forward (nn.Linear convention)."""
    B, N, C = x.shape
    hd = C // num_heads
    scale = hd ** (-0.5)
    qkv = x @ Wqkv.T
    dq = (x @ WAq.T) @ WBq.T
    dv = (x @ WAv.T) @ WBv.T
    q, k, v = jnp.split(qkv, 3, axis=-1)
    q = q + dq
    v = v + dv

    def to_heads(t):
        return t.reshape(B, N, num_heads, hd).transpose(0, 2, 1, 3)

    q, k, v = to_heads(q), to_heads(k), to_heads(v)
    attn = jnp.einsum('bhnd,bhmd->bhnm', q, k) * scale
    attn = jax.nn.softmax(attn, axis=-1)
    ctx = jnp.einsum('bhnm,bhmd->bhnd', attn, v).transpose(0, 2, 1, 3).reshape(B, N, C)
    return ctx @ Wproj.T + bproj


if __name__ == "__main__":
    # Small shapes consistent with the module: dim=C, N tokens per sequence.
    B, N, C = 2, 16, 64
    num_heads = 8
    lora_r = 8
    num_tasks = 10
    task_id = 0

    key = jax.random.PRNGKey(0)
    keys = jax.random.split(key, 8)

    x = jax.random.normal(keys[0], (B, N, C), dtype=jnp.float32)

    # PyTorch nn.Linear weight shape is (out_features, in_features).
    Wqkv = 0.05 * jax.random.normal(keys[1], (3 * C, C), dtype=jnp.float32)   # qkv_bias=False
    Wproj = 0.05 * jax.random.normal(keys[2], (C, C), dtype=jnp.float32)
    bproj = 0.05 * jax.random.normal(keys[3], (C,), dtype=jnp.float32)

    # Per-task LoRA weights (stacked over tasks); module inits lora_B to zeros,
    # here we use small nonzero values so the LoRA path is actually exercised.
    WAq_all = 0.05 * jax.random.normal(keys[4], (num_tasks, lora_r, C), dtype=jnp.float32)
    WBq_all = 0.05 * jax.random.normal(keys[5], (num_tasks, C, lora_r), dtype=jnp.float32)
    WAv_all = 0.05 * jax.random.normal(keys[6], (num_tasks, lora_r, C), dtype=jnp.float32)
    WBv_all = 0.05 * jax.random.normal(keys[7], (num_tasks, C, lora_r), dtype=jnp.float32)

    WAq, WBq = WAq_all[task_id], WBq_all[task_id]
    WAv, WBv = WAv_all[task_id], WBv_all[task_id]

    out = attention_lora_forward(
        x,
        Wqkv.T, WAq.T, WBq.T, WAv.T, WBv.T, Wproj.T, bproj,
        num_heads=num_heads,
    )
    out = jax.block_until_ready(out)

    ref = reference_forward(x, Wqkv, WAq, WBq, WAv, WBv, Wproj, bproj,
                            num_heads=num_heads)
    assert out.shape == (B, N, C)
    # bf16 matmuls + approx reciprocal vs. pure-f32 reference -> relaxed tolerance.
    assert jnp.allclose(out, ref, atol=2e-2, rtol=2e-2), "mismatch vs reference"

    print("KERNEL_OK")
</pallas_src>

<mosaic_0001>
module attributes {stable_mosaic.version = 11 : i64} {
  func.func @attn_lora_kernel(%arg0: i32, %arg1: memref<2x16x64xf32, #tpu.memory_space<vmem>>, %arg2: memref<64x208xbf16, #tpu.memory_space<vmem>>, %arg3: memref<8x64xbf16, #tpu.memory_space<vmem>>, %arg4: memref<8x64xbf16, #tpu.memory_space<vmem>>, %arg5: memref<64x64xbf16, #tpu.memory_space<vmem>>, %arg6: memref<1x64xf32, #tpu.memory_space<vmem>>, %arg7: memref<2x16x64xf32, #tpu.memory_space<vmem>>, %arg8: memref<2x16x64xbf16, #tpu.memory_space<vmem>>) attributes {dimension_semantics = [#tpu.dimension_semantics<parallel>], iteration_bounds = array<i64: 1>, scalar_prefetch = 0 : i64, scratch_operands = 1 : i64, tpu.core_type = #tpu.core_type<tc>, window_params = [{transform_indices = @transform_0, window_bounds = array<i64: 2, 16, 64>}, {pipeline_mode = #tpu.pipeline_mode<synchronous>, transform_indices = @transform_1, window_bounds = array<i64: 64, 208>}, {pipeline_mode = #tpu.pipeline_mode<synchronous>, transform_indices = @transform_2, window_bounds = array<i64: 8, 64>}, {pipeline_mode = #tpu.pipeline_mode<synchronous>, transform_indices = @transform_3, window_bounds = array<i64: 8, 64>}, {pipeline_mode = #tpu.pipeline_mode<synchronous>, transform_indices = @transform_4, window_bounds = array<i64: 64, 64>}, {pipeline_mode = #tpu.pipeline_mode<synchronous>, transform_indices = @transform_5, window_bounds = array<i64: 1, 64>}, {transform_indices = @transform_6, window_bounds = array<i64: 2, 16, 64>}]} {
    %c0 = arith.constant 0 : index
    %c0_0 = arith.constant 0 : index
    %c0_1 = arith.constant 0 : index
    %0 = vector.load %arg1[%c0, %c0_0, %c0_1] : memref<2x16x64xf32, #tpu.memory_space<vmem>>, vector<2x16x64xf32>
    %1 = vector.shape_cast %0 : vector<2x16x64xf32> to vector<32x64xf32>
    %2 = arith.truncf %1 : vector<32x64xf32> to vector<32x64xbf16>
    %c0_2 = arith.constant 0 : index
    %c0_3 = arith.constant 0 : index
    %3 = vector.load %arg2[%c0_2, %c0_3] : memref<64x208xbf16, #tpu.memory_space<vmem>>, vector<64x208xbf16>
    %cst = arith.constant dense<0.000000e+00> : vector<32x208xf32>
    %4 = tpu.matmul %2, %3, %cst {dimension_numbers = #tpu.dot_dimension_numbers<[1], [0], [0], [1], [0, 0, 1, 1], [], []>} : vector<32x64xbf16>, vector<64x208xbf16>, vector<32x208xf32> -> vector<32x208xf32>
    %5 = vector.extract_strided_slice %4 {offsets = [0, 0], sizes = [32, 64], strides = [1, 1]} : vector<32x208xf32> to vector<32x64xf32>
    %6 = vector.extract_strided_slice %4 {offsets = [0, 64], sizes = [32, 64], strides = [1, 1]} : vector<32x208xf32> to vector<32x64xf32>
    %7 = vector.extract_strided_slice %4 {offsets = [0, 128], sizes = [32, 64], strides = [1, 1]} : vector<32x208xf32> to vector<32x64xf32>
    %8 = vector.extract_strided_slice %4 {offsets = [0, 192], sizes = [32, 8], strides = [1, 1]} : vector<32x208xf32> to vector<32x8xf32>
    %9 = vector.extract_strided_slice %4 {offsets = [0, 200], sizes = [32, 8], strides = [1, 1]} : vector<32x208xf32> to vector<32x8xf32>
    %10 = arith.truncf %8 : vector<32x8xf32> to vector<32x8xbf16>
    %c0_4 = arith.constant 0 : index
    %c0_5 = arith.constant 0 : index
    %11 = vector.load %arg3[%c0_4, %c0_5] : memref<8x64xbf16, #tpu.memory_space<vmem>>, vector<8x64xbf16>
    %cst_6 = arith.constant dense<0.000000e+00> : vector<32x64xf32>
    %12 = tpu.matmul %10, %11, %cst_6 {dimension_numbers = #tpu.dot_dimension_numbers<[1], [0], [0], [1], [0, 0, 1, 1], [], []>} : vector<32x8xbf16>, vector<8x64xbf16>, vector<32x64xf32> -> vector<32x64xf32>
    %13 = arith.truncf %9 : vector<32x8xf32> to vector<32x8xbf16>
    %c0_7 = arith.constant 0 : index
    %c0_8 = arith.constant 0 : index
    %14 = vector.load %arg4[%c0_7, %c0_8] : memref<8x64xbf16, #tpu.memory_space<vmem>>, vector<8x64xbf16>
    %cst_9 = arith.constant dense<0.000000e+00> : vector<32x64xf32>
    %15 = tpu.matmul %13, %14, %cst_9 {dimension_numbers = #tpu.dot_dimension_numbers<[1], [0], [0], [1], [0, 0, 1, 1], [], []>} : vector<32x8xbf16>, vector<8x64xbf16>, vector<32x64xf32> -> vector<32x64xf32>
    %16 = arith.addf %5, %12 : vector<32x64xf32>
    %cst_10 = arith.constant 0.353553385 : f32
    %17 = vector.broadcast %cst_10 : f32 to vector<32x64xf32>
    %18 = arith.mulf %16, %17 : vector<32x64xf32>
    %19 = vector.shape_cast %18 : vector<32x64xf32> to vector<2x16x64xf32>
    %20 = arith.truncf %19 : vector<2x16x64xf32> to vector<2x16x64xbf16>
    %21 = vector.shape_cast %6 : vector<32x64xf32> to vector<2x16x64xf32>
    %22 = arith.truncf %21 : vector<2x16x64xf32> to vector<2x16x64xbf16>
    %23 = arith.addf %7, %15 : vector<32x64xf32>
    %24 = vector.shape_cast %23 : vector<32x64xf32> to vector<2x16x64xf32>
    %25 = arith.truncf %24 : vector<2x16x64xf32> to vector<2x16x64xbf16>
    %26 = vector.extract_strided_slice %20 {offsets = [0, 0, 0], sizes = [2, 16, 8], strides = [1, 1, 1]} : vector<2x16x64xbf16> to vector<2x16x8xbf16>
    %27 = vector.extract_strided_slice %22 {offsets = [0, 0, 0], sizes = [2, 16, 8], strides = [1, 1, 1]} : vector<2x16x64xbf16> to vector<2x16x8xbf16>
    %28 = vector.extract_strided_slice %25 {offsets = [0, 0, 0], sizes = [2, 16, 8], strides = [1, 1, 1]} : vector<2x16x64xbf16> to vector<2x16x8xbf16>
    "tpu.trace_start"() <{level = 10 : i32, message = "bqd,bkd->bqk"}> : () -> ()
    %cst_11 = arith.constant dense<0.000000e+00> : vector<2x16x16xf32>
    %29 = tpu.matmul %26, %27, %cst_11 {dimension_numbers = #tpu.dot_dimension_numbers<[2], [2], [1], [1], [0, 0, 0, 1, 1, 1], [0], [0]>} : vector<2x16x8xbf16>, vector<2x16x8xbf16>, vector<2x16x16xf32> -> vector<2x16x16xf32>
    "tpu.trace_stop"() : () -> ()
    %cst_12 = arith.constant dense<0xFF800000> : vector<2x16xf32>
    %30 = vector.multi_reduction <maximumf>, %29, %cst_12 [2] : vector<2x16x16xf32> to vector<2x16xf32>
    %31 = vector.shape_cast %30 : vector<2x16xf32> to vector<2x16x1xf32>
    %32 = vector.broadcast %31 : vector<2x16x1xf32> to vector<2x16x16xf32>
    %33 = arith.subf %29, %32 : vector<2x16x16xf32>
    %34 = math.exp %33 : vector<2x16x16xf32>
    %cst_13 = arith.constant dense<0.000000e+00> : vector<2x16xf32>
    %35 = vector.multi_reduction <add>, %34, %cst_13 [2] : vector<2x16x16xf32> to vector<2x16xf32>
    %36 = vector.shape_cast %35 : vector<2x16xf32> to vector<2x16x1xf32>
    %37 = tpu.reciprocal %36 {approx = true} : vector<2x16x1xf32> -> vector<2x16x1xf32>
    %38 = vector.broadcast %37 : vector<2x16x1xf32> to vector<2x16x16xf32>
    %39 = arith.mulf %34, %38 : vector<2x16x16xf32>
    %40 = arith.truncf %39 : vector<2x16x16xf32> to vector<2x16x16xbf16>
    "tpu.trace_start"() <{level = 10 : i32, message = "bqk,bkd->bqd"}> : () -> ()
    %cst_14 = arith.constant dense<0.000000e+00> : vector<2x16x8xf32>
    %41 = tpu.matmul %40, %28, %cst_14 {dimension_numbers = #tpu.dot_dimension_numbers<[2], [1], [1], [2], [0, 0, 0, 1, 1, 2], [0], [0]>} : vector<2x16x16xbf16>, vector<2x16x8xbf16>, vector<2x16x8xf32> -> vector<2x16x8xf32>
    "tpu.trace_stop"() : () -> ()
    %42 = arith.truncf %41 : vector<2x16x8xf32> to vector<2x16x8xbf16>
    %c0_15 = arith.constant 0 : index
    %c0_16 = arith.constant 0 : index
    %c0_17 = arith.constant 0 : index
    %43 = vector.load %arg8[%c0_15, %c0_16, %c0_17] : memref<2x16x64xbf16, #tpu.memory_space<vmem>>, vector<2x16x8xbf16>
    tpu.vector_store %arg8[%c0_15, %c0_16, %c0_17], %42 {strides = array<i32>} : memref<2x16x64xbf16, #tpu.memory_space<vmem>>, vector<2x16x8xbf16>,
    %44 = vector.extract_strided_slice %20 {offsets = [0, 0, 8], sizes = [2, 16, 8], strides = [1, 1, 1]} : vector<2x16x64xbf16> to vector<2x16x8xbf16>
    %45 = vector.extract_strided_slice %22 {offsets = [0, 0, 8], sizes = [2, 16, 8], strides = [1, 1, 1]} : vector<2x16x64xbf16> to vector<2x16x8xbf16>
    %46 = vector.extract_strided_slice %25 {offsets = [0, 0, 8], sizes = [2, 16, 8], strides = [1, 1, 1]} : vector<2x16x64xbf16> to vector<2x16x8xbf16>
    "tpu.trace_start"() <{level = 10 : i32, message = "bqd,bkd->bqk"}> : () -> ()
    %cst_18 = arith.constant dense<0.000000e+00> : vector<2x16x16xf32>
    %47 = tpu.matmul %44, %45, %cst_18 {dimension_numbers = #tpu.dot_dimension_numbers<[2], [2], [1], [1], [0, 0, 0, 1, 1, 1], [0], [0]>} : vector<2x16x8xbf16>, vector<2x16x8xbf16>, vector<2x16x16xf32> -> vector<2x16x16xf32>
    "tpu.trace_stop"() : () -> ()
    %cst_19 = arith.constant dense<0xFF800000> : vector<2x16xf32>
    %48 = vector.multi_reduction <maximumf>, %47, %cst_19 [2] : vector<2x16x16xf32> to vector<2x16xf32>
    %49 = vector.shape_cast %48 : vector<2x16xf32> to vector<2x16x1xf32>
    %50 = vector.broadcast %49 : vector<2x16x1xf32> to vector<2x16x16xf32>
    %51 = arith.subf %47, %50 : vector<2x16x16xf32>
    %52 = math.exp %51 : vector<2x16x16xf32>
    %cst_20 = arith.constant dense<0.000000e+00> : vector<2x16xf32>
    %53 = vector.multi_reduction <add>, %52, %cst_20 [2] : vector<2x16x16xf32> to vector<2x16xf32>
    %54 = vector.shape_cast %53 : vector<2x16xf32> to vector<2x16x1xf32>
    %55 = tpu.reciprocal %54 {approx = true} : vector<2x16x1xf32> -> vector<2x16x1xf32>
    %56 = vector.broadcast %55 : vector<2x16x1xf32> to vector<2x16x16xf32>
    %57 = arith.mulf %52, %56 : vector<2x16x16xf32>
    %58 = arith.truncf %57 : vector<2x16x16xf32> to vector<2x16x16xbf16>
    "tpu.trace_start"() <{level = 10 : i32, message = "bqk,bkd->bqd"}> : () -> ()
    %cst_21 = arith.constant dense<0.000000e+00> : vector<2x16x8xf32>
    %59 = tpu.matmul %58, %46, %cst_21 {dimension_numbers = #tpu.dot_dimension_numbers<[2], [1], [1], [2], [0, 0, 0, 1, 1, 2], [0], [0]>} : vector<2x16x16xbf16>, vector<2x16x8xbf16>, vector<2x16x8xf32> -> vector<2x16x8xf32>
    "tpu.trace_stop"() : () -> ()
    %60 = arith.truncf %59 : vector<2x16x8xf32> to vector<2x16x8xbf16>
    %c0_22 = arith.constant 0 : index
    %c0_23 = arith.constant 0 : index
    %c8 = arith.constant 8 : index
    %61 = vector.load %arg8[%c0_22, %c0_23, %c8] : memref<2x16x64xbf16, #tpu.memory_space<vmem>>, vector<2x16x8xbf16>
    tpu.vector_store %arg8[%c0_22, %c0_23, %c8], %60 {strides = array<i32>} : memref<2x16x64xbf16, #tpu.memory_space<vmem>>, vector<2x16x8xbf16>,
    %62 = vector.extract_strided_slice %20 {offsets = [0, 0, 16], sizes = [2, 16, 8], strides = [1, 1, 1]} : vector<2x16x64xbf16> to vector<2x16x8xbf16>
    %63 = vector.extract_strided_slice %22 {offsets = [0, 0, 16], sizes = [2, 16, 8], strides = [1, 1, 1]} : vector<2x16x64xbf16> to vector<2x16x8xbf16>
    %64 = vector.extract_strided_slice %25 {offsets = [0, 0, 16], sizes = [2, 16, 8], strides = [1, 1, 1]} : vector<2x16x64xbf16> to vector<2x16x8xbf16>
    "tpu.trace_start"() <{level = 10 : i32, message = "bqd,bkd->bqk"}> : () -> ()
    %cst_24 = arith.constant dense<0.000000e+00> : vector<2x16x16xf32>
    %65 = tpu.matmul %62, %63, %cst_24 {dimension_numbers = #tpu.dot_dimension_numbers<[2], [2], [1], [1], [0, 0, 0, 1, 1, 1], [0], [0]>} : vector<2x16x8xbf16>, vector<2x16x8xbf16>, vector<2x16x16xf32> -> vector<2x16x16xf32>
    "tpu.trace_stop"() : () -> ()
    %cst_25 = arith.constant dense<0xFF800000> : vector<2x16xf32>
    %66 = vector.multi_reduction <maximumf>, %65, %cst_25 [2] : vector<2x16x16xf32> to vector<2x16xf32>
    %67 = vector.shape_cast %66 : vector<2x16xf32> to vector<2x16x1xf32>
    %68 = vector.broadcast %67 : vector<2x16x1xf32> to vector<2x16x16xf32>
    %69 = arith.subf %65, %68 : vector<2x16x16xf32>
    %70 = math.exp %69 : vector<2x16x16xf32>
    %cst_26 = arith.constant dense<0.000000e+00> : vector<2x16xf32>
    %71 = vector.multi_reduction <add>, %70, %cst_26 [2] : vector<2x16x16xf32> to vector<2x16xf32>
    %72 = vector.shape_cast %71 : vector<2x16xf32> to vector<2x16x1xf32>
    %73 = tpu.reciprocal %72 {approx = true} : vector<2x16x1xf32> -> vector<2x16x1xf32>
    %74 = vector.broadcast %73 : vector<2x16x1xf32> to vector<2x16x16xf32>
    %75 = arith.mulf %70, %74 : vector<2x16x16xf32>
    %76 = arith.truncf %75 : vector<2x16x16xf32> to vector<2x16x16xbf16>
    "tpu.trace_start"() <{level = 10 : i32, message = "bqk,bkd->bqd"}> : () -> ()
    %cst_27 = arith.constant dense<0.000000e+00> : vector<2x16x8xf32>
    %77 = tpu.matmul %76, %64, %cst_27 {dimension_numbers = #tpu.dot_dimension_numbers<[2], [1], [1], [2], [0, 0, 0, 1, 1, 2], [0], [0]>} : vector<2x16x16xbf16>, vector<2x16x8xbf16>, vector<2x16x8xf32> -> vector<2x16x8xf32>
    "tpu.trace_stop"() : () -> ()
    %78 = arith.truncf %77 : vector<2x16x8xf32> to vector<2x16x8xbf16>
    %c0_28 = arith.constant 0 : index
    %c0_29 = arith.constant 0 : index
    %c16 = arith.constant 16 : index
    %79 = vector.load %arg8[%c0_28, %c0_29, %c16] : memref<2x16x64xbf16, #tpu.memory_space<vmem>>, vector<2x16x8xbf16>
    tpu.vector_store %arg8[%c0_28, %c0_29, %c16], %78 {strides = array<i32>} : memref<2x16x64xbf16, #tpu.memory_space<vmem>>, vector<2x16x8xbf16>,
    %80 = vector.extract_strided_slice %20 {offsets = [0, 0, 24], sizes = [2, 16, 8], strides = [1, 1, 1]} : vector<2x16x64xbf16> to vector<2x16x8xbf16>
    %81 = vector.extract_strided_slice %22 {offsets = [0, 0, 24], sizes = [2, 16, 8], strides = [1, 1, 1]} : vector<2x16x64xbf16> to vector<2x16x8xbf16>
    %82 = vector.extract_strided_slice %25 {offsets = [0, 0, 24], sizes = [2, 16, 8], strides = [1, 1, 1]} : vector<2x16x64xbf16> to vector<2x16x8xbf16>
    "tpu.trace_start"() <{level = 10 : i32, message = "bqd,bkd->bqk"}> : () -> ()
    %cst_30 = arith.constant dense<0.000000e+00> : vector<2x16x16xf32>
    %83 = tpu.matmul %80, %81, %cst_30 {dimension_numbers = #tpu.dot_dimension_numbers<[2], [2], [1], [1], [0, 0, 0, 1, 1, 1], [0], [0]>} : vector<2x16x8xbf16>, vector<2x16x8xbf16>, vector<2x16x16xf32> -> vector<2x16x16xf32>
    "tpu.trace_stop"() : () -> ()
    %cst_31 = arith.constant dense<0xFF800000> : vector<2x16xf32>
    %84 = vector.multi_reduction <maximumf>, %83, %cst_31 [2] : vector<2x16x16xf32> to vector<2x16xf32>
    %85 = vector.shape_cast %84 : vector<2x16xf32> to vector<2x16x1xf32>
    %86 = vector.broadcast %85 : vector<2x16x1xf32> to vector<2x16x16xf32>
    %87 = arith.subf %83, %86 : vector<2x16x16xf32>
    %88 = math.exp %87 : vector<2x16x16xf32>
    %cst_32 = arith.constant dense<0.000000e+00> : vector<2x16xf32>
    %89 = vector.multi_reduction <add>, %88, %cst_32 [2] : vector<2x16x16xf32> to vector<2x16xf32>
    %90 = vector.shape_cast %89 : vector<2x16xf32> to vector<2x16x1xf32>
    %91 = tpu.reciprocal %90 {approx = true} : vector<2x16x1xf32> -> vector<2x16x1xf32>
    %92 = vector.broadcast %91 : vector<2x16x1xf32> to vector<2x16x16xf32>
    %93 = arith.mulf %88, %92 : vector<2x16x16xf32>
    %94 = arith.truncf %93 : vector<2x16x16xf32> to vector<2x16x16xbf16>
    "tpu.trace_start"() <{level = 10 : i32, message = "bqk,bkd->bqd"}> : () -> ()
    %cst_33 = arith.constant dense<0.000000e+00> : vector<2x16x8xf32>
    %95 = tpu.matmul %94, %82, %cst_33 {dimension_numbers = #tpu.dot_dimension_numbers<[2], [1], [1], [2], [0, 0, 0, 1, 1, 2], [0], [0]>} : vector<2x16x16xbf16>, vector<2x16x8xbf16>, vector<2x16x8xf32> -> vector<2x16x8xf32>
    "tpu.trace_stop"() : () -> ()
    %96 = arith.truncf %95 : vector<2x16x8xf32> to vector<2x16x8xbf16>
    %c0_34 = arith.constant 0 : index
    %c0_35 = arith.constant 0 : index
    %c24 = arith.constant 24 : index
    %97 = vector.load %arg8[%c0_34, %c0_35, %c24] : memref<2x16x64xbf16, #tpu.memory_space<vmem>>, vector<2x16x8xbf16>
    tpu.vector_store %arg8[%c0_34, %c0_35, %c24], %96 {strides = array<i32>} : memref<2x16x64xbf16, #tpu.memory_space<vmem>>, vector<2x16x8xbf16>,
    %98 = vector.extract_strided_slice %20 {offsets = [0, 0, 32], sizes = [2, 16, 8], strides = [1, 1, 1]} : vector<2x16x64xbf16> to vector<2x16x8xbf16>
    %99 = vector.extract_strided_slice %22 {offsets = [0, 0, 32], sizes = [2, 16, 8], strides = [1, 1, 1]} : vector<2x16x64xbf16> to vector<2x16x8xbf16>
    %100 = vector.extract_strided_slice %25 {offsets = [0, 0, 32], sizes = [2, 16, 8], strides = [1, 1, 1]} : vector<2x16x64xbf16> to vector<2x16x8xbf16>
    "tpu.trace_start"() <{level = 10 : i32, message = "bqd,bkd->bqk"}> : () -> ()
    %cst_36 = arith.constant dense<0.000000e+00> : vector<2x16x16xf32>
    %101 = tpu.matmul %98, %99, %cst_36 {dimension_numbers = #tpu.dot_dimension_numbers<[2], [2], [1], [1], [0, 0, 0, 1, 1, 1], [0], [0]>} : vector<2x16x8xbf16>, vector<2x16x8xbf16>, vector<2x16x16xf32> -> vector<2x16x16xf32>
    "tpu.trace_stop"() : () -> ()
    %cst_37 = arith.constant dense<0xFF800000> : vector<2x16xf32>
    %102 = vector.multi_reduction <maximumf>, %101, %cst_37 [2] : vector<2x16x16xf32> to vector<2x16xf32>
    %103 = vector.shape_cast %102 : vector<2x16xf32> to vector<2x16x1xf32>
    %104 = vector.broadcast %103 : vector<2x16x1xf32> to vector<2x16x16xf32>
    %105 = arith.subf %101, %104 : vector<2x16x16xf32>
    %106 = math.exp %105 : vector<2x16x16xf32>
    %cst_38 = arith.constant dense<0.000000e+00> : vector<2x16xf32>
    %107 = vector.multi_reduction <add>, %106, %cst_38 [2] : vector<2x16x16xf32> to vector<2x16xf32>
    %108 = vector.shape_cast %107 : vector<2x16xf32> to vector<2x16x1xf32>
    %109 = tpu.reciprocal %108 {approx = true} : vector<2x16x1xf32> -> vector<2x16x1xf32>
    %110 = vector.broadcast %109 : vector<2x16x1xf32> to vector<2x16x16xf32>
    %111 = arith.mulf %106, %110 : vector<2x16x16xf32>
    %112 = arith.truncf %111 : vector<2x16x16xf32> to vector<2x16x16xbf16>
    "tpu.trace_start"() <{level = 10 : i32, message = "bqk,bkd->bqd"}> : () -> ()
    %cst_39 = arith.constant dense<0.000000e+00> : vector<2x16x8xf32>
    %113 = tpu.matmul %112, %100, %cst_39 {dimension_numbers = #tpu.dot_dimension_numbers<[2], [1], [1], [2], [0, 0, 0, 1, 1, 2], [0], [0]>} : vector<2x16x16xbf16>, vector<2x16x8xbf16>, vector<2x16x8xf32> -> vector<2x16x8xf32>
    "tpu.trace_stop"() : () -> ()
    %114 = arith.truncf %113 : vector<2x16x8xf32> to vector<2x16x8xbf16>
    %c0_40 = arith.constant 0 : index
    %c0_41 = arith.constant 0 : index
    %c32 = arith.constant 32 : index
    %115 = vector.load %arg8[%c0_40, %c0_41, %c32] : memref<2x16x64xbf16, #tpu.memory_space<vmem>>, vector<2x16x8xbf16>
    tpu.vector_store %arg8[%c0_40, %c0_41, %c32], %114 {strides = array<i32>} : memref<2x16x64xbf16, #tpu.memory_space<vmem>>, vector<2x16x8xbf16>,
    %116 = vector.extract_strided_slice %20 {offsets = [0, 0, 40], sizes = [2, 16, 8], strides = [1, 1, 1]} : vector<2x16x64xbf16> to vector<2x16x8xbf16>
    %117 = vector.extract_strided_slice %22 {offsets = [0, 0, 40], sizes = [2, 16, 8], strides = [1, 1, 1]} : vector<2x16x64xbf16> to vector<2x16x8xbf16>
    %118 = vector.extract_strided_slice %25 {offsets = [0, 0, 40], sizes = [2, 16, 8], strides = [1, 1, 1]} : vector<2x16x64xbf16> to vector<2x16x8xbf16>
    "tpu.trace_start"() <{level = 10 : i32, message = "bqd,bkd->bqk"}> : () -> ()
    %cst_42 = arith.constant dense<0.000000e+00> : vector<2x16x16xf32>
    %119 = tpu.matmul %116, %117, %cst_42 {dimension_numbers = #tpu.dot_dimension_numbers<[2], [2], [1], [1], [0, 0, 0, 1, 1, 1], [0], [0]>} : vector<2x16x8xbf16>, vector<2x16x8xbf16>, vector<2x16x16xf32> -> vector<2x16x16xf32>
    "tpu.trace_stop"() : () -> ()
    %cst_43 = arith.constant dense<0xFF800000> : vector<2x16xf32>
    %120 = vector.multi_reduction <maximumf>, %119, %cst_43 [2] : vector<2x16x16xf32> to vector<2x16xf32>
    %121 = vector.shape_cast %120 : vector<2x16xf32> to vector<2x16x1xf32>
    %122 = vector.broadcast %121 : vector<2x16x1xf32> to vector<2x16x16xf32>
    %123 = arith.subf %119, %122 : vector<2x16x16xf32>
    %124 = math.exp %123 : vector<2x16x16xf32>
    %cst_44 = arith.constant dense<0.000000e+00> : vector<2x16xf32>
    %125 = vector.multi_reduction <add>, %124, %cst_44 [2] : vector<2x16x16xf32> to vector<2x16xf32>
    %126 = vector.shape_cast %125 : vector<2x16xf32> to vector<2x16x1xf32>
    %127 = tpu.reciprocal %126 {approx = true} : vector<2x16x1xf32> -> vector<2x16x1xf32>
    %128 = vector.broadcast %127 : vector<2x16x1xf32> to vector<2x16x16xf32>
    %129 = arith.mulf %124, %128 : vector<2x16x16xf32>
    %130 = arith.truncf %129 : vector<2x16x16xf32> to vector<2x16x16xbf16>
    "tpu.trace_start"() <{level = 10 : i32, message = "bqk,bkd->bqd"}> : () -> ()
    %cst_45 = arith.constant dense<0.000000e+00> : vector<2x16x8xf32>
    %131 = tpu.matmul %130, %118, %cst_45 {dimension_numbers = #tpu.dot_dimension_numbers<[2], [1], [1], [2], [0, 0, 0, 1, 1, 2], [0], [0]>} : vector<2x16x16xbf16>, vector<2x16x8xbf16>, vector<2x16x8xf32> -> vector<2x16x8xf32>
    "tpu.trace_stop"() : () -> ()
    %132 = arith.truncf %131 : vector<2x16x8xf32> to vector<2x16x8xbf16>
    %c0_46 = arith.constant 0 : index
    %c0_47 = arith.constant 0 : index
    %c40 = arith.constant 40 : index
    %133 = vector.load %arg8[%c0_46, %c0_47, %c40] : memref<2x16x64xbf16, #tpu.memory_space<vmem>>, vector<2x16x8xbf16>
    tpu.vector_store %arg8[%c0_46, %c0_47, %c40], %132 {strides = array<i32>} : memref<2x16x64xbf16, #tpu.memory_space<vmem>>, vector<2x16x8xbf16>,
    %134 = vector.extract_strided_slice %20 {offsets = [0, 0, 48], sizes = [2, 16, 8], strides = [1, 1, 1]} : vector<2x16x64xbf16> to vector<2x16x8xbf16>
    %135 = vector.extract_strided_slice %22 {offsets = [0, 0, 48], sizes = [2, 16, 8], strides = [1, 1, 1]} : vector<2x16x64xbf16> to vector<2x16x8xbf16>
    %136 = vector.extract_strided_slice %25 {offsets = [0, 0, 48], sizes = [2, 16, 8], strides = [1, 1, 1]} : vector<2x16x64xbf16> to vector<2x16x8xbf16>
    "tpu.trace_start"() <{level = 10 : i32, message = "bqd,bkd->bqk"}> : () -> ()
    %cst_48 = arith.constant dense<0.000000e+00> : vector<2x16x16xf32>
    %137 = tpu.matmul %134, %135, %cst_48 {dimension_numbers = #tpu.dot_dimension_numbers<[2], [2], [1], [1], [0, 0, 0, 1, 1, 1], [0], [0]>} : vector<2x16x8xbf16>, vector<2x16x8xbf16>, vector<2x16x16xf32> -> vector<2x16x16xf32>
    "tpu.trace_stop"() : () -> ()
    %cst_49 = arith.constant dense<0xFF800000> : vector<2x16xf32>
    %138 = vector.multi_reduction <maximumf>, %137, %cst_49 [2] : vector<2x16x16xf32> to vector<2x16xf32>
    %139 = vector.shape_cast %138 : vector<2x16xf32> to vector<2x16x1xf32>
    %140 = vector.broadcast %139 : vector<2x16x1xf32> to vector<2x16x16xf32>
    %141 = arith.subf %137, %140 : vector<2x16x16xf32>
    %142 = math.exp %141 : vector<2x16x16xf32>
    %cst_50 = arith.constant dense<0.000000e+00> : vector<2x16xf32>
    %143 = vector.multi_reduction <add>, %142, %cst_50 [2] : vector<2x16x16xf32> to vector<2x16xf32>
    %144 = vector.shape_cast %143 : vector<2x16xf32> to vector<2x16x1xf32>
    %145 = tpu.reciprocal %144 {approx = true} : vector<2x16x1xf32> -> vector<2x16x1xf32>
    %146 = vector.broadcast %145 : vector<2x16x1xf32> to vector<2x16x16xf32>
    %147 = arith.mulf %142, %146 : vector<2x16x16xf32>
    %148 = arith.truncf %147 : vector<2x16x16xf32> to vector<2x16x16xbf16>
    "tpu.trace_start"() <{level = 10 : i32, message = "bqk,bkd->bqd"}> : () -> ()
    %cst_51 = arith.constant dense<0.000000e+00> : vector<2x16x8xf32>
    %149 = tpu.matmul %148, %136, %cst_51 {dimension_numbers = #tpu.dot_dimension_numbers<[2], [1], [1], [2], [0, 0, 0, 1, 1, 2], [0], [0]>} : vector<2x16x16xbf16>, vector<2x16x8xbf16>, vector<2x16x8xf32> -> vector<2x16x8xf32>
    "tpu.trace_stop"() : () -> ()
    %150 = arith.truncf %149 : vector<2x16x8xf32> to vector<2x16x8xbf16>
    %c0_52 = arith.constant 0 : index
    %c0_53 = arith.constant 0 : index
    %c48 = arith.constant 48 : index
    %151 = vector.load %arg8[%c0_52, %c0_53, %c48] : memref<2x16x64xbf16, #tpu.memory_space<vmem>>, vector<2x16x8xbf16>
    tpu.vector_store %arg8[%c0_52, %c0_53, %c48], %150 {strides = array<i32>} : memref<2x16x64xbf16, #tpu.memory_space<vmem>>, vector<2x16x8xbf16>,
    %152 = vector.extract_strided_slice %20 {offsets = [0, 0, 56], sizes = [2, 16, 8], strides = [1, 1, 1]} : vector<2x16x64xbf16> to vector<2x16x8xbf16>
    %153 = vector.extract_strided_slice %22 {offsets = [0, 0, 56], sizes = [2, 16, 8], strides = [1, 1, 1]} : vector<2x16x64xbf16> to vector<2x16x8xbf16>
    %154 = vector.extract_strided_slice %25 {offsets = [0, 0, 56], sizes = [2, 16, 8], strides = [1, 1, 1]} : vector<2x16x64xbf16> to vector<2x16x8xbf16>
    "tpu.trace_start"() <{level = 10 : i32, message = "bqd,bkd->bqk"}> : () -> ()
    %cst_54 = arith.constant dense<0.000000e+00> : vector<2x16x16xf32>
    %155 = tpu.matmul %152, %153, %cst_54 {dimension_numbers = #tpu.dot_dimension_numbers<[2], [2], [1], [1], [0, 0, 0, 1, 1, 1], [0], [0]>} : vector<2x16x8xbf16>, vector<2x16x8xbf16>, vector<2x16x16xf32> -> vector<2x16x16xf32>
    "tpu.trace_stop"() : () -> ()
    %cst_55 = arith.constant dense<0xFF800000> : vector<2x16xf32>
    %156 = vector.multi_reduction <maximumf>, %155, %cst_55 [2] : vector<2x16x16xf32> to vector<2x16xf32>
    %157 = vector.shape_cast %156 : vector<2x16xf32> to vector<2x16x1xf32>
    %158 = vector.broadcast %157 : vector<2x16x1xf32> to vector<2x16x16xf32>
    %159 = arith.subf %155, %158 : vector<2x16x16xf32>
    %160 = math.exp %159 : vector<2x16x16xf32>
    %cst_56 = arith.constant dense<0.000000e+00> : vector<2x16xf32>
    %161 = vector.multi_reduction <add>, %160, %cst_56 [2] : vector<2x16x16xf32> to vector<2x16xf32>
    %162 = vector.shape_cast %161 : vector<2x16xf32> to vector<2x16x1xf32>
    %163 = tpu.reciprocal %162 {approx = true} : vector<2x16x1xf32> -> vector<2x16x1xf32>
    %164 = vector.broadcast %163 : vector<2x16x1xf32> to vector<2x16x16xf32>
    %165 = arith.mulf %160, %164 : vector<2x16x16xf32>
    %166 = arith.truncf %165 : vector<2x16x16xf32> to vector<2x16x16xbf16>
    "tpu.trace_start"() <{level = 10 : i32, message = "bqk,bkd->bqd"}> : () -> ()
    %cst_57 = arith.constant dense<0.000000e+00> : vector<2x16x8xf32>
    %167 = tpu.matmul %166, %154, %cst_57 {dimension_numbers = #tpu.dot_dimension_numbers<[2], [1], [1], [2], [0, 0, 0, 1, 1, 2], [0], [0]>} : vector<2x16x16xbf16>, vector<2x16x8xbf16>, vector<2x16x8xf32> -> vector<2x16x8xf32>
    "tpu.trace_stop"() : () -> ()
    %168 = arith.truncf %167 : vector<2x16x8xf32> to vector<2x16x8xbf16>
    %c0_58 = arith.constant 0 : index
    %c0_59 = arith.constant 0 : index
    %c56 = arith.constant 56 : index
    %169 = vector.load %arg8[%c0_58, %c0_59, %c56] : memref<2x16x64xbf16, #tpu.memory_space<vmem>>, vector<2x16x8xbf16>
    tpu.vector_store %arg8[%c0_58, %c0_59, %c56], %168 {strides = array<i32>} : memref<2x16x64xbf16, #tpu.memory_space<vmem>>, vector<2x16x8xbf16>,
    %c0_60 = arith.constant 0 : index
    %c0_61 = arith.constant 0 : index
    %c0_62 = arith.constant 0 : index
    %170 = vector.load %arg8[%c0_60, %c0_61, %c0_62] : memref<2x16x64xbf16, #tpu.memory_space<vmem>>, vector<2x16x64xbf16>
    %171 = vector.shape_cast %170 : vector<2x16x64xbf16> to vector<32x64xbf16>
    %c0_63 = arith.constant 0 : index
    %c0_64 = arith.constant 0 : index
    %172 = vector.load %arg5[%c0_63, %c0_64] : memref<64x64xbf16, #tpu.memory_space<vmem>>, vector<64x64xbf16>
    %cst_65 = arith.constant dense<0.000000e+00> : vector<32x64xf32>
    %173 = tpu.matmul %171, %172, %cst_65 {dimension_numbers = #tpu.dot_dimension_numbers<[1], [0], [0], [1], [0, 0, 1, 1], [], []>} : vector<32x64xbf16>, vector<64x64xbf16>, vector<32x64xf32> -> vector<32x64xf32>
    %c0_66 = arith.constant 0 : index
    %c0_67 = arith.constant 0 : index
    %174 = vector.load %arg6[%c0_66, %c0_67] : memref<1x64xf32, #tpu.memory_space<vmem>>, vector<1x64xf32>
    %175 = vector.broadcast %174 : vector<1x64xf32> to vector<32x64xf32>
    %176 = arith.addf %173, %175 : vector<32x64xf32>
    %177 = vector.shape_cast %176 : vector<32x64xf32> to vector<2x16x64xf32>
    %c0_68 = arith.constant 0 : index
    %c0_69 = arith.constant 0 : index
    %c0_70 = arith.constant 0 : index
    %178 = vector.load %arg7[%c0_68, %c0_69, %c0_70] : memref<2x16x64xf32, #tpu.memory_space<vmem>>, vector<2x16x64xf32>
    tpu.vector_store %arg7[%c0_68, %c0_69, %c0_70], %177 {strides = array<i32>} : memref<2x16x64xf32, #tpu.memory_space<vmem>>, vector<2x16x64xf32>,
    return
  }
  func.func @transform_0(%arg0: i32) -> (i32, i32, i32) {
    %c0_i32 = arith.constant 0 : i32
    %c0_i32_0 = arith.constant 0 : i32
    %c0_i32_1 = arith.constant 0 : i32
    return %arg0, %c0_i32, %c0_i32_0 : i32, i32, i32
  }
  func.func @transform_1(%arg0: i32) -> (i32, i32) {
    %c0_i32 = arith.constant 0 : i32
    %c0_i32_0 = arith.constant 0 : i32
    %c0_i32_1 = arith.constant 0 : i32
    return %c0_i32, %c0_i32_0 : i32, i32
  }
  func.func @transform_2(%arg0: i32) -> (i32, i32) {
    %c0_i32 = arith.constant 0 : i32
    %c0_i32_0 = arith.constant 0 : i32
    %c0_i32_1 = arith.constant 0 : i32
    return %c0_i32, %c0_i32_0 : i32, i32
  }
  func.func @transform_3(%arg0: i32) -> (i32, i32) {
    %c0_i32 = arith.constant 0 : i32
    %c0_i32_0 = arith.constant 0 : i32
    %c0_i32_1 = arith.constant 0 : i32
    return %c0_i32, %c0_i32_0 : i32, i32
  }
  func.func @transform_4(%arg0: i32) -> (i32, i32) {
    %c0_i32 = arith.constant 0 : i32
    %c0_i32_0 = arith.constant 0 : i32
    %c0_i32_1 = arith.constant 0 : i32
    return %c0_i32, %c0_i32_0 : i32, i32
  }
  func.func @transform_5(%arg0: i32) -> (i32, i32) {
    %c0_i32 = arith.constant 0 : i32
    %c0_i32_0 = arith.constant 0 : i32
    %c0_i32_1 = arith.constant 0 : i32
    return %c0_i32, %c0_i32_0 : i32, i32
  }
  func.func @transform_6(%arg0: i32) -> (i32, i32, i32) {
    %c0_i32 = arith.constant 0 : i32
    %c0_i32_0 = arith.constant 0 : i32
    %c0_i32_1 = arith.constant 0 : i32
    return %arg0, %c0_i32, %c0_i32_0 : i32, i32, i32
  }
}

</mosaic_0001>

<bundles_post_ra>
// kernel: tpu_custom_call.1
= control target key start
LH: loop header
LB: loop body
LE: loop exit
PB: predicated region body
PF: predicated region fallthrough
CT: control target
= control target key end

     0   :  { %11 = vsyncpa [#allocation4], 0  ;;  %s2875_s0 = inlined_call_operand.hbm [shape: f32[2,16,64], index: 0, kind: input, shape index: {}]   ;;  %s2876_s1 = inlined_call_operand.hbm [shape: bf16[64,208], index: 1, kind: input, shape index: {}]   ;;  %s2877_s2 = inlined_call_operand.hbm [shape: bf16[8,64], index: 2, kind: input, shape index: {}]   ;;  %s2878_s3 = inlined_call_operand.hbm [shape: bf16[8,64], index: 3, kind: input, shape index: {}]   ;;  %s2879_s4 = inlined_call_operand.hbm [shape: bf16[64,64], index: 4, kind: input, shape index: {}]   ;;  %s2880_s5 = inlined_call_operand.vmem [shape: f32[1,64], index: 5, kind: input, shape index: {}]   ;;  %s2881_s6 = inlined_call_operand.hbm [shape: f32[2,16,64], index: 6, kind: output, shape index: {}]  }
   0x1   :  { %12 = vsyncpa [#allocation7], 0 }
   0x2   :  { %13 = vsyncpa [#allocation10], 0 }
   0x3   :  { %14 = vsyncpa [#allocation5], 0  ;;  %s32_s23 = sshll.u32 %s2876_s1, 4  ;;  %s2186_s24 = smov [#allocation6]   ;;  %s33_s23 = int_to_ptr.hbm [resolvable:$true] %s32_s23 }
   0x4   :  { %s34_s25 = sshll.u32 %s2186_s24, 4  ;;  %s57_s28 = sshll.u32 %s2878_s3, 4  ;;  %s35_s25 = int_to_ptr.vmem [resolvable:$true] %s34_s25  ;;  %s58_s28 = int_to_ptr.hbm [resolvable:$true] %s57_s28 }
   0x5   :  { %s2187_s29 = smov 128   ;;  %s2188_s30 = smov 8  }
   0x6   :  { %40 = dma.hbm_to_vmem [thread:$0]  %s33_s23, 1024, %s35_s25, [#allocation7], %s2187_s29, %s2187_s29, %s2188_s30  }
   0x7   :  { %s2189_s7 = smov [#allocation9]   ;;  %s19_s1 = sshll.u32 %s2875_s0, 4  ;;  %s20_s1 = int_to_ptr.hbm [resolvable:$true] %s19_s1 }
   0x8   :  { %s59_s8 = sshll.u32 %s2189_s7, 4  ;;  %s46_s3 = sshll.u32 %s2877_s2, 4  ;;  %s60_s8 = int_to_ptr.vmem [resolvable:$true] %s59_s8  ;;  %s47_s3 = int_to_ptr.hbm [resolvable:$true] %s46_s3 }
   0x9   :  { %62 = dma.hbm_to_vmem [thread:$0]  %s58_s28, 64, %s60_s8, [#allocation10]  }
   0xa   :  { %s2190_s13 = smov [#allocation3]   ;;  %s2191_s15 = smov [#allocation8]  }
   0xb   :  { %s21_s14 = sshll.u32 %s2190_s13, 4  ;;  %s48_s16 = sshll.u32 %s2191_s15, 4  ;;  %s22_s14 = int_to_ptr.vmem [resolvable:$true] %s21_s14  ;;  %s49_s16 = int_to_ptr.vmem [resolvable:$true] %s48_s16 }
   0xc   :  { %27 = dma.hbm_to_vmem [thread:$0]  %s20_s1, 512, %s22_s14, [#allocation4], %s2187_s29, %s2187_s29, %s2188_s30  }
   0xd   :  { %s67_s0 = sshll.u32 %s2879_s4, 4  ;;  %s2192_s19 = smov [#allocation11]   ;;  %s68_s0 = int_to_ptr.hbm [resolvable:$true] %s67_s0 }
   0xe   :  { %51 = dma.hbm_to_vmem [thread:$0]  %s47_s3, 64, %s49_s16, [#allocation7]  }
   0xf   :  { %s69_s20 = sshll.u32 %s2192_s19, 4  ;;  %s2193_s2 = smov 64   ;;  %s70_s20 = int_to_ptr.vmem [resolvable:$true] %s69_s20 }
  0x10   :  { %s2194_s21 = smov 4  }
  0x11   :  { %75 = dma.hbm_to_vmem [thread:$0]  %s68_s0, 512, %s70_s20, [#allocation10], %s2193_s2, %s2193_s2, %s2194_s21  }
  0x12   :  { %2178 = dma.done.wait [#allocation4], 512  }
  0x13   :  { %2179 = vsyncadd [#allocation4], 4294966784 }
  0x14   :  { %2180 = dma.done.wait [#allocation7], 1088  }
  0x15   :  { %2181 = vsyncadd [#allocation7], 4294966208 }
  0x16   :  { %2182 = dma.done.wait [#allocation10], 576  }
  0x17   :  { %2183 = vsyncadd [#allocation10], 4294966720  ;;  %v1873_v0 = vld [vmem:[#allocation6 + $0x34] sm:$0xf]  ;;  %v1797_v1 = vld [vmem:[#allocation6 + $0x38] sm:$0xf0] }
  0x18   :  { %v1871_v2 = vld [vmem:[#allocation6 + $0x24] sm:$0xf]  ;;  %v1800_v3 = vor.u32 %v1873_v0, %v1797_v1  ;;  %v1789_v4 = vld [vmem:[#allocation6 + $0x28] sm:$0xf0]  ;;  %v1869_v6 = vld [vmem:[#allocation6 + $0x14] sm:$0xf] }
  0x19   :  { %v1792_v5 = vor.u32 %v1871_v2, %v1789_v4  ;;  %v1781_v7 = vld [vmem:[#allocation6 + $0x18] sm:$0xf0]  ;;  %v1795_v8 = vld [vmem:[#allocation6 + $0x30] sm:$0xf]  ;;  %v1874_v9 = vld [vmem:[#allocation6 + $0x34] sm:$0xf0] }
  0x1a   :  { %183 = vmatpush.bf16.msra.mxu1 %v1800_v3  ;;  %v1787_v10 = vld [vmem:[#allocation6 + $0x20] sm:$0xf]  ;;  %v1796_v11 = vor.u32 %v1874_v9, %v1795_v8  ;;  %v1872_v12 = vld [vmem:[#allocation6 + $0x24] sm:$0xf0]  ;;  %v1784_v13 = vor.u32 %v1869_v6, %v1781_v7  ;;  %v1867_v14 = vld [vmem:[#allocation6 + $0x4] sm:$0xf] }
  0x1b   :  { %v1788_v15 = vor.u32 %v1872_v12, %v1787_v10  ;;  %v1773_v16 = vld [vmem:[#allocation6 + $0x8] sm:$0xf0]  ;;  %v1779_v17 = vld [vmem:[#allocation6 + $0x10] sm:$0xf]  ;;  %v1870_v18 = vld [vmem:[#allocation6 + $0x14] sm:$0xf0] }
  0x1c   :  { %164 = vmatpush.bf16.msra.mxu0 %v1796_v11  ;;  %v1776_v19 = vor.u32 %v1867_v14, %v1773_v16  ;;  %v99_v20 = vld [vmem:[#allocation3] sm:$0xff]  ;;  %v100_v21 = vld [vmem:[#allocation3 + $0x8] sm:$0xff]  ;;  %v1780_v22 = vor.u32 %v1870_v18, %v1779_v17  ;;  %vm153_vm0 = vcmask 523264   ;;  %v101_v27 = vld [vmem:[#allocation3 + $0x10] sm:$0xff]  ;;  %s2195_s4 = smov 56   ;;  %s2196_s22 = smov 40  }
  0x1d   :  { %v1771_v23 = vld [vmem:[#allocation6] sm:$0xf]  ;;  %v1868_v24 = vld [vmem:[#allocation6 + $0x4] sm:$0xf0]  ;;  %v103_v25 = vpack.c.bf16 %v100_v21, %v99_v20  ;;  %v102_v28 = vld [vmem:[#allocation3 + $0x18] sm:$0xff]  ;;  %s2197_s23 = smov 48  }
  0x1e   :  { %184 = vmatpush.bf16.msra.mxu1 %v1792_v5  ;;  %v1772_v26 = vor.u32 %v1868_v24, %v1771_v23  ;;  %v104_v29 = vpack.c.bf16 %v102_v28, %v101_v27  ;;  %v200_v46 = vld [vmem:[#allocation8] sm:$0xf]  ;;  %vm214_vm1 = vcmask 1043456   ;;  %s2198_s24 = smov 32   ;;  %v237_v52 = vld [vmem:[#allocation9] sm:$0xf] }
  0x1f   :  { %v216_v49 = vsel %vm214_vm1, %v200_v46, 0  ;;  %v249_v53 = vsel %vm214_vm1, %v237_v52, 0  ;;  %vm207_vm2 = vcmask 64512   ;;  %s2199_s25 = smov 120   ;;  %s2200_s26 = smov 104   ;;  %vm358_vm3 = vcmask 130048  }
  0x20   :  { %165 = vmatpush.bf16.msra.mxu0 %v1788_v15  ;;  %225 = vmatpush.bf16.msra.mxu2 %v216_v49  ;;  %s2201_s27 = smov 112   ;;  %s2202_s28 = smov 24   ;;  %vm467_vm4 = vcmask 60416   ;;  %vm638_vm5 = vcmask 126016   ;;  %vm809_vm6 = vcmask 191616   ;;  %vm980_vm7 = vcmask 257216  }
  0x21   :  { %1881 = vmatpush.bf16.msra.mxu3 %v216_v49  ;;  %s2203_s7 = smov 88   ;;  %s2204_s8 = smov 96   ;;  %vm1151_vm8 = vcmask 322816   ;;  %vm1322_vm9 = vcmask 388416   ;;  %vm1493_vm10 = vcmask 454016   ;;  %vm1664_vm11 = vcmask 519616  }
  0x22   :  { %185 = vmatpush.bf16.msra.mxu1 %v1784_v13  ;;  %s2205_s9 = smov 80   ;;  %s2206_s10 = smov 16  }
  0x23   :  { %s2207_s1 = smov 72   ;;  %s2208_s3 = smov [#allocation12]  }
  0x24   :  { %166 = vmatpush.bf16.msra.mxu0 %v1780_v22  ;;  %s1752_s13 = sshll.u32 %s2208_s3, 4  ;;  %s1754_s16 = sshll.u32 %s2881_s6, 4  ;;  %s1753_s13 = int_to_ptr.vmem [resolvable:$true] %s1752_s13  ;;  %s1755_s16 = int_to_ptr.hbm [resolvable:$true] %s1754_s16 }
  0x25   :  { %258 = vmatpush.bf16.msrb.mxu3 %v249_v53 }
  0x26   :  { %186 = vmatpush.bf16.msra.mxu1 %v1776_v19 }
  0x28   :  { %167 = vmatpush.bf16.msra.mxu0 %v1772_v26 }
  0x29   :  { %1803 = vmatmul.msk.bf16.vlgmr.msra.gmra.mxu1 %vm153_vm0, %v103_v25 }
  0x2b   :  { %1801 = vmatmul.msk.bf16.vlgmr.msra.gmra.mxu0 %vm153_vm0, %v103_v25 }
  0x39   :  { %1804 = vmatmul.msk.bf16.gmra.mxu1 %vm153_vm0, %v104_v29 }
  0x3b   :  { %1802 = vmatmul.msk.bf16.gmra.mxu0 %vm153_vm0, %v104_v29 }
  0xa6   :  { %v2271_v30 = vpop.f32.mrf.mxu1 }
  0xa8   :  { %v2273_v31 = vpop.f32.mrf.mxu0 }
  0xa9   :  { %v282_v34 = vpack.c.bf16 %v2273_v31, %v2273_v31 }
  0xab   :  { %v301_v36 = vunpack.c.l.b16 %v282_v34 }
  0xae   :  { %v2275_v32 = vpop.f32.mrf.mxu1 }
  0xaf   :  { %v198_v33 = vpack.c.bf16 %v2275_v32, %v2271_v30 }
  0xb0   :  { %v171_v35 = vpop.f32.mrf.mxu0 }
  0xb1   :  { %238 = vrot.lane.b32.xlu1 %v198_v33, %s2195_s4  ;;  %203 = vrot.lane.b32.xlu0 %v198_v33, %s2193_s2  ;;  %v283_v37 = vpack.c.bf16 %v171_v35, %v171_v35 }
  0xb3   :  { %v302_v38 = vunpack.c.l.b16 %v283_v37 }
  0xb5   :  { %v2285_v40 = vpack.c.b16 %v302_v38, %v301_v36 }
  0xb6   :  { %v2283_v39 = vpop.f32.mrf.mxu1 }
  0xb8   :  { %v174_v43 = vpop.f32.mrf.mxu0 }
  0xb9   :  { %304 = vrot.lane.b32.xlu1 %v2285_v40, %s2193_s2  ;;  %v284_v44 = vpack.c.bf16 %v174_v43, %v174_v43 }
  0xbb   :  { %v333_v47 = vunpack.c.l.b16 %v284_v44 }
  0xbe   :  { %v2289_v41 = vpop.f32.mrf.mxu1 }
  0xbf   :  { %v199_v42 = vpack.c.bf16 %v2289_v41, %v2283_v39 }
  0xc0   :  { %v2301_v45 = vpop.f32.mrf.mxu0 }
  0xc1   :  { %240 = vrot.lane.b32.xlu2 %v199_v42, %s2195_s4  ;;  %205 = vrot.lane.b32.xlu0 %v199_v42, %s2193_s2  ;;  %v285_v48 = vpack.c.bf16 %v2301_v45, %v2301_v45 }
  0xc2   :  { %816 = vrot.lane.b32.xlu1 %v2285_v40, %s2196_s22 }
  0xc3   :  { %v334_v50 = vunpack.c.l.b16 %v285_v48 }
  0xc5   :  { %v2305_v51 = vpack.c.b16 %v334_v50, %v333_v47 }
  0xc9   :  { %474 = vrot.lane.b32.xlu0 %v2285_v40, %s2195_s4  ;;  %336 = vrot.lane.b32.xlu2 %v2305_v51, %s2193_s2 }
  0xd1   :  { %645 = vrot.lane.b32.xlu0 %v2285_v40, %s2197_s23  ;;  %498 = vrot.lane.b32.xlu2 %v2305_v51, %s2195_s4 }
  0xd9   :  { %669 = vrot.lane.b32.xlu0 %v2305_v51, %s2197_s23  ;;  %987 = vrot.lane.b32.xlu2 %v2285_v40, %s2198_s24 }
 0x11b   :  { %v241_v57 = vpop.permute.xlu2 %240 }
 0x123   :  { %v204_v54 = vpop.permute.xlu0 %203  ;;  %v239_v56 = vpop.permute.xlu1 %238 }
 0x124   :  { %1805 = vmatmul.msk.bf16.vlgmr.msra.gmra.mxu2 %vm207_vm2, %v204_v54  ;;  %v337_v58 = vpop.permute.xlu2 %336 }
 0x125   :  { %v342_v59 = vsel %vm207_vm2, %v337_v58, 0 }
 0x12b   :  { %v305_v0 = vpop.permute.xlu1 %304 }
 0x12c   :  { %v499_v60 = vpop.permute.xlu2 %498  ;;  %v310_v1 = vsel %vm207_vm2, %v305_v0, 0 }
 0x12d   :  { %v504_v61 = vsel %vm207_vm2, %v499_v60, 0  ;;  %319 = vmatpush.bf16.xpose.msrb.mxu2 %v310_v1 }
 0x133   :  { %v206_v55 = vpop.permute.xlu0 %205 }
 0x134   :  { %1806 = vmatmul.msk.bf16.vlgmr.msra.gmra.mxu3 %vm207_vm2, %v206_v55 }
 0x135   :  { %351 = vmatpush.bf16.xpose.msra.mxu3 %v342_v59 }
 0x13b   :  { %v475_v62 = vpop.permute.xlu0 %474 }
 0x13c   :  { %v480_v63 = vsel %vm207_vm2, %v475_v62, 0 }
 0x13d   :  { %489 = vmatpush.bf16.xpose.msra.mxu2 %v480_v63 }
 0x143   :  { %v646_v12 = vpop.permute.xlu0 %645 }
 0x144   :  { %1807 = vmatmul.msk.bf16.vlgmr.msrb.gmra.mxu3 %vm207_vm2, %v239_v56  ;;  %v651_v15 = vsel %vm207_vm2, %v646_v12, 0 }
 0x145   :  { %513 = vmatpush.bf16.xpose.msrb.mxu3 %v504_v61 }
 0x14b   :  { %v670_v23 = vpop.permute.xlu0 %669 }
 0x14c   :  { %v675_v28 = vsel %vm207_vm2, %v670_v23, 0 }
 0x154   :  { %1808 = vmatmul.msk.bf16.gmra.mxu3 %vm207_vm2, %v241_v57 }
 0x1a7   :  { %v227_v2 = vpop.f32.mrf.mxu2 }
 0x1a8   :  { %v270_v3 = vadd.f32 %v227_v2, %v2273_v31 }
 0x1aa   :  { %v274_v4 = vmul.f32 0.35355338, %v270_v3 }
 0x1ac   :  { %v278_v7 = vpack.c.bf16 %v274_v4, %v274_v4 }
 0x1ae   :  { %v296_v10 = vunpack.c.l.b16 %v278_v7 }
 0x1af   :  { %v229_v5 = vpop.f32.mrf.mxu2 }
 0x1b0   :  { %v271_v6 = vadd.f32 %v229_v5, %v171_v35 }
 0x1b2   :  { %v275_v8 = vmul.f32 0.35355338, %v271_v6 }
 0x1b4   :  { %v279_v9 = vpack.c.bf16 %v275_v8, %v275_v8 }
 0x1b6   :  { %v297_v11 = vunpack.c.l.b16 %v279_v9 }
 0x1b7   :  { %v232_v13 = vpop.f32.mrf.mxu3 }
 0x1b8   :  { %v2324_v14 = vpack.c.b16 %v297_v11, %v296_v10  ;;  %v272_v16 = vadd.f32 %v232_v13, %v174_v43 }
 0x1ba   :  { %472 = vrot.lane.b32.xlu1 %v2324_v14, %s2199_s25  ;;  %1809 = vmatmul.msk.bf16.vlgmr.msrb.gmra.mxu2 %vm207_vm2, %v2324_v14  ;;  %v276_v17 = vmul.f32 0.35355338, %v272_v16 }
 0x1bb   :  { %660 = vmatpush.bf16.xpose.msrb.mxu2 %v651_v15  ;;  %814 = vrot.lane.b32.xlu0 %v2324_v14, %s2200_s26 }
 0x1bc   :  { %643 = vrot.lane.b32.xlu2 %v2324_v14, %s2201_s27  ;;  %v280_v20 = vpack.c.bf16 %v276_v17, %v276_v17 }
 0x1be   :  { %v328_v24 = vunpack.c.l.b16 %v280_v20 }
 0x1bf   :  { %v234_v18 = vpop.f32.mrf.mxu3 }
 0x1c0   :  { %v273_v19 = vadd.f32 %v234_v18, %v2301_v45 }
 0x1c2   :  { %v277_v21 = vmul.f32 0.35355338, %v273_v19  ;;  %840 = vrot.lane.b32.xlu1 %v2305_v51, %s2196_s22 }
 0x1c3   :  { %1158 = vrot.lane.b32.xlu0 %v2285_v40, %s2202_s28 }
 0x1c4   :  { %v281_v22 = vpack.c.bf16 %v277_v21, %v277_v21  ;;  %1011 = vrot.lane.b32.xlu2 %v2305_v51, %s2198_s24 }
 0x1c6   :  { %v329_v25 = vunpack.c.l.b16 %v281_v22 }
 0x1c7   :  { %v260_v26 = vpop.f32.mrf.mxu3 }
 0x1c8   :  { %v330_v27 = vpack.c.b16 %v329_v25, %v328_v24  ;;  %v286_v29 = vadd.f32 %v260_v26, %v2271_v30 }
 0x1ca   :  { %496 = vrot.lane.b32.xlu1 %v330_v27, %s2199_s25  ;;  %1810 = vmatmul.msk.bf16.vlgmr.msra.gmra.mxu3 %vm207_vm2, %v330_v27  ;;  %v290_v33 = vpack.c.bf16 %v286_v29, %v286_v29 }
 0x1cb   :  { %1182 = vrot.lane.b32.xlu0 %v2305_v51, %s2202_s28  ;;  %684 = vmatpush.bf16.xpose.msra.mxu3 %v675_v28 }
 0x1cc   :  { %1156 = vrot.lane.b32.xlu2 %v2324_v14, %s2203_s7  ;;  %v414_v36 = vunpack.c.l.b16 %v290_v33 }
 0x1cf   :  { %v262_v31 = vpop.f32.mrf.mxu3 }
 0x1d0   :  { %v287_v34 = vadd.f32 %v262_v31, %v2275_v32 }
 0x1d2   :  { %v291_v35 = vpack.c.bf16 %v287_v34, %v287_v34  ;;  %985 = vrot.lane.b32.xlu1 %v2324_v14, %s2204_s8 }
 0x1d3   :  { %1327 = vrot.lane.b32.xlu0 %v2324_v14, %s2205_s9 }
 0x1d4   :  { %v415_v37 = vunpack.c.l.b16 %v291_v35  ;;  %667 = vrot.lane.b32.xlu2 %v330_v27, %s2201_s27 }
 0x1d6   :  { %v2356_v30 = vpack.c.b16 %v415_v37, %v414_v36 }
 0x1d7   :  { %v265_v38 = vpop.f32.mrf.mxu3 }
 0x1d8   :  { %428 = vmatpush.bf16.msrb.mxu0 %v2356_v30  ;;  %v288_v32 = vadd.f32 %v265_v38, %v2283_v39  ;;  %v817_v39 = vpop.permute.xlu1 %816 }
 0x1d9   :  { %v822_v49 = vsel %vm207_vm2, %v817_v39, 0 }
 0x1da   :  { %1329 = vrot.lane.b32.xlu1 %v2285_v40, %s2206_s10  ;;  %v292_v43 = vpack.c.bf16 %v288_v32, %v288_v32 }
 0x1db   :  { %838 = vrot.lane.b32.xlu0 %v330_v27, %s2200_s26 }
 0x1dc   :  { %1500 = vrot.lane.b32.xlu2 %v2285_v40, %s2188_s30  ;;  %v442_v46 = vunpack.c.l.b16 %v292_v43  ;;  %v988_v40 = vpop.permute.xlu2 %987 }
 0x1dd   :  { %v993_v56 = vsel %vm207_vm2, %v988_v40, 0 }
 0x1df   :  { %v267_v42 = vpop.f32.mrf.mxu3 }
 0x1e0   :  { %v289_v44 = vadd.f32 %v267_v42, %v2289_v41 }
 0x1e2   :  { %v293_v45 = vpack.c.bf16 %v289_v44, %v289_v44  ;;  %1353 = vrot.lane.b32.xlu1 %v2305_v51, %s2206_s10 }
 0x1e3   :  { %1351 = vrot.lane.b32.xlu0 %v330_v27, %s2205_s9 }
 0x1e4   :  { %v443_v47 = vunpack.c.l.b16 %v293_v45  ;;  %1524 = vrot.lane.b32.xlu2 %v2305_v51, %s2188_s30 }
 0x1e6   :  { %v2371_v48 = vpack.c.b16 %v443_v47, %v442_v46 }
 0x1e8   :  { %456 = vmatpush.bf16.msrb.mxu1 %v2371_v48 }
 0x1ea   :  { %1498 = vrot.lane.b32.xlu1 %v2324_v14, %s2207_s1 }
 0x1eb   :  { %1522 = vrot.lane.b32.xlu0 %v330_v27, %s2207_s1 }
 0x1ec   :  { %1180 = vrot.lane.b32.xlu2 %v330_v27, %s2203_s7 }
 0x1f2   :  { %1009 = vrot.lane.b32.xlu1 %v330_v27, %s2204_s8 }
 0x1f3   :  { %1086 = vrot.lane.b32.xlu0 %v2356_v30, %s2204_s8 }
 0x1f4   :  { %744 = vrot.lane.b32.xlu2 %v2356_v30, %s2201_s27 }
 0x1fa   :  { %573 = vrot.lane.b32.xlu1 %v2356_v30, %s2199_s25 }
 0x1fb   :  { %598 = vrot.lane.b32.xlu0 %v2371_v48, %s2199_s25 }
 0x1fc   :  { %915 = vrot.lane.b32.xlu2 %v2356_v30, %s2200_s26 }
 0x202   :  { %1257 = vrot.lane.b32.xlu1 %v2356_v30, %s2203_s7 }
 0x203   :  { %769 = vrot.lane.b32.xlu0 %v2371_v48, %s2201_s27 }
 0x204   :  { %1111 = vrot.lane.b32.xlu2 %v2371_v48, %s2204_s8 }
 0x20a   :  { %940 = vrot.lane.b32.xlu1 %v2371_v48, %s2200_s26 }
 0x216   :  { %v644_v51 = vpop.permute.xlu2 %643 }
 0x21e   :  { %v1012_v54 = vpop.permute.xlu2 %1011 }
 0x21f   :  { %v1017_v4 = vsel %vm207_vm2, %v1012_v54, 0 }
 0x226   :  { %v1157_v61 = vpop.permute.xlu2 %1156 }
 0x22c   :  { %v473_v41 = vpop.permute.xlu1 %472 }
 0x22d   :  { %v815_v50 = vpop.permute.xlu0 %814  ;;  %1813 = vmatmul.msk.bf16.vlgmr.msra.gmra.mxu2 %vm207_vm2, %v473_v41 }
 0x22e   :  { %831 = vmatpush.bf16.xpose.msra.mxu2 %v822_v49  ;;  %v668_v2 = vpop.permute.xlu2 %667 }
 0x234   :  { %v841_v52 = vpop.permute.xlu1 %840 }
 0x235   :  { %v1159_v53 = vpop.permute.xlu0 %1158  ;;  %v846_v57 = vsel %vm207_vm2, %v841_v52, 0 }
 0x236   :  { %v1164_v5 = vsel %vm207_vm2, %v1159_v53, 0  ;;  %v1501_v19 = vpop.permute.xlu2 %1500 }
 0x237   :  { %v1506_v22 = vsel %vm207_vm2, %v1501_v19, 0 }
 0x23c   :  { %v497_v55 = vpop.permute.xlu1 %496 }
 0x23d   :  { %v1183_v58 = vpop.permute.xlu0 %1182  ;;  %v2401_v59 = vpop.f32.mrf.mxu2  ;;  %1814 = vmatmul.msk.bf16.vlgmr.msrb.gmra.mxu3 %vm207_vm2, %v497_v55  ;;  %1817 = vmatmul.msk.bf16.vlgmr.msrb.gmra.mxu2 %vm207_vm2, %v644_v51 }
 0x23e   :  { %855 = vmatpush.bf16.xpose.msrb.mxu3 %v846_v57  ;;  %1002 = vmatpush.bf16.xpose.msrb.mxu2 %v993_v56  ;;  %v359_v60 = vsel %vm358_vm3, %v2401_v59, -inf  ;;  %v1188_v14 = vsel %vm207_vm2, %v1183_v58, 0  ;;  %v1525_v24 = vpop.permute.xlu2 %1524 }
 0x23f   :  { %360 = vmax.xlane.f32.xlu1 %v359_v60  ;;  %v1530_v26 = vsel %vm207_vm2, %v1525_v24, 0 }
 0x244   :  { %v986_v62 = vpop.permute.xlu1 %985 }
 0x245   :  { %v1328_v63 = vpop.permute.xlu0 %1327  ;;  %v2407_v0 = vpop.f32.mrf.mxu2 }
 0x246   :  { %v362_v1 = vsel %vm358_vm3, %v2407_v0, -inf  ;;  %v1181_v25 = vpop.permute.xlu2 %1180 }
 0x247   :  { %363 = vmax.xlane.f32.xlu2 %v362_v1 }
 0x24c   :  { %v1330_v3 = vpop.permute.xlu1 %1329 }
 0x24d   :  { %v839_v6 = vpop.permute.xlu0 %838  ;;  %v2413_v7 = vpop.f32.mrf.mxu3  ;;  %1818 = vmatmul.msk.bf16.vlgmr.msra.gmra.mxu3 %vm207_vm2, %v668_v2  ;;  %1821 = vmatmul.msk.bf16.vlgmr.msra.gmra.mxu2 %vm207_vm2, %v815_v50  ;;  %v1335_v15 = vsel %vm207_vm2, %v1330_v3, 0 }
 0x24e   :  { %1026 = vmatpush.bf16.xpose.msra.mxu3 %v1017_v4  ;;  %1173 = vmatpush.bf16.xpose.msra.mxu2 %v1164_v5  ;;  %v365_v8 = vsel %vm358_vm3, %v2413_v7, -inf  ;;  %v2439_v27 = vpop.permute.xlu2 %744 }
 0x24f   :  { %366 = vmax.xlane.f32.xlu0 %v365_v8 }
 0x254   :  { %v1354_v9 = vpop.permute.xlu1 %1353 }
 0x255   :  { %v1352_v10 = vpop.permute.xlu0 %1351  ;;  %v2419_v11 = vpop.f32.mrf.mxu3  ;;  %v1359_v23 = vsel %vm207_vm2, %v1354_v9, 0 }
 0x256   :  { %v368_v12 = vsel %vm358_vm3, %v2419_v11, -inf  ;;  %v2443_v29 = vpop.permute.xlu2 %915 }
 0x257   :  { %369 = vmax.xlane.f32.xlu2 %v368_v12 }
 0x25c   :  { %v1499_v13 = vpop.permute.xlu1 %1498 }
 0x25d   :  { %v1523_v16 = vpop.permute.xlu0 %1522  ;;  %1822 = vmatmul.msk.bf16.vlgmr.msrb.gmra.mxu3 %vm207_vm2, %v839_v6  ;;  %1825 = vmatmul.msk.bf16.vlgmr.msrb.gmra.mxu2 %vm207_vm2, %v986_v62 }
 0x25e   :  { %1197 = vmatpush.bf16.xpose.msrb.mxu3 %v1188_v14  ;;  %1344 = vmatpush.bf16.xpose.msrb.mxu2 %v1335_v15  ;;  %v2451_v35 = vpop.permute.xlu2 %1111 }
 0x264   :  { %v1010_v17 = vpop.permute.xlu1 %1009 }
 0x265   :  { %v2427_v18 = vpop.permute.xlu0 %1086 }
 0x26c   :  { %v574_v20 = vpop.permute.xlu1 %573 }
 0x26d   :  { %v599_v21 = vpop.permute.xlu0 %598  ;;  %586 = vmatpush.bf16.msra.mxu0 %v574_v20  ;;  %1826 = vmatmul.msk.bf16.vlgmr.msra.gmra.mxu3 %vm207_vm2, %v1010_v17 }
 0x26e   :  { %611 = vmatpush.bf16.msra.mxu1 %v599_v21  ;;  %1829 = vmatmul.msk.bf16.vlgmr.msra.gmra.mxu2 %vm207_vm2, %v1157_v61 }
 0x26f   :  { %1368 = vmatpush.bf16.xpose.msra.mxu3 %v1359_v23  ;;  %1515 = vmatpush.bf16.xpose.msra.mxu2 %v1506_v22 }
 0x274   :  { %v2441_v28 = vpop.permute.xlu1 %1257 }
 0x275   :  { %v2458_v43 = vpop.permute.xlu0 %769 }
 0x27c   :  { %v2445_v31 = vpop.permute.xlu1 %940 }
 0x27d   :  { %1830 = vmatmul.msk.bf16.vlgmr.msrb.gmra.mxu3 %vm207_vm2, %v1181_v25 }
 0x27e   :  { %1833 = vmatmul.msk.bf16.vlgmr.msrb.gmra.mxu2 %vm207_vm2, %v1328_v63  ;;  %1539 = vmatpush.bf16.xpose.msrb.mxu3 %v1530_v26 }
 0x28d   :  { %1834 = vmatmul.msk.bf16.vlgmr.msra.gmra.mxu3 %vm207_vm2, %v1352_v10 }
 0x28e   :  { %1837 = vmatmul.msk.bf16.vlgmr.msra.gmra.mxu2 %vm207_vm2, %v1499_v13 }
 0x29d   :  { %1838 = vmatmul.msk.bf16.vlgmr.msrb.gmra.mxu3 %vm207_vm2, %v1523_v16 }
 0x2b0   :  { %v2447_v33 = vpop.f32.mrf.mxu2 }
 0x2b1   :  { %v520_v34 = vsel %vm358_vm3, %v2447_v33, -inf }
 0x2b2   :  { %521 = vmax.xlane.f32.xlu1 %v520_v34  ;;  %v361_v36 = vpop.xlane.xlu1 %360 }
 0x2b3   :  { %v371_v37 = vsub.f32 %v2401_v59, %v361_v36 }
 0x2b5   :  { %v375_v38 = vmul.f32 1.442695, %v371_v37 }
 0x2b7   :  { %1906 = vpow2.f32 %v375_v38 }
 0x2b8   :  { %v2454_v32 = vpop.f32.mrf.mxu2 }
 0x2b9   :  { %v523_v42 = vsel %vm358_vm3, %v2454_v32, -inf }
 0x2ba   :  { %v364_v44 = vpop.xlane.xlu2 %363  ;;  %524 = vmax.xlane.f32.xlu2 %v523_v42 }
 0x2bb   :  { %v372_v45 = vsub.f32 %v2407_v0, %v364_v44 }
 0x2bd   :  { %v377_v46 = vmul.f32 1.442695, %v372_v45  ;;  %v2461_v47 = vpop.eup %1906 }
 0x2be   :  { %v383_v49 = vsel %vm358_vm3, %v2461_v47, 0.0 }
 0x2bf   :  { %1908 = vpow2.f32 %v377_v46 }
 0x2c0   :  { %v2463_v39 = vpop.f32.mrf.mxu3  ;;  %v2465_v40 = vpop.f32.mrf.mxu2 }
 0x2c1   :  { %v526_v41 = vsel %vm358_vm3, %v2463_v39, -inf  ;;  %v691_v58 = vsel %vm358_vm3, %v2465_v40, -inf }
 0x2c2   :  { %v367_v50 = vpop.xlane.xlu0 %366  ;;  %527 = vmax.xlane.f32.xlu0 %v526_v41  ;;  %384 = vadd.xlane.f32.xlu2 %v383_v49 }
 0x2c3   :  { %v373_v51 = vsub.f32 %v2413_v7, %v367_v50 }
 0x2c5   :  { %v379_v52 = vmul.f32 1.442695, %v373_v51  ;;  %v2472_v53 = vpop.eup %1908 }
 0x2c6   :  { %v386_v56 = vsel %vm358_vm3, %v2472_v53, 0.0 }
 0x2c7   :  { %1910 = vpow2.f32 %v379_v52 }
 0x2c8   :  { %v2474_v54 = vpop.f32.mrf.mxu3  ;;  %v2476_v55 = vpop.f32.mrf.mxu2 }
 0x2c9   :  { %v529_v57 = vsel %vm358_vm3, %v2474_v54, -inf  ;;  %v694_v0 = vsel %vm358_vm3, %v2476_v55, -inf }
 0x2ca   :  { %387 = vadd.xlane.f32.xlu0 %v386_v56  ;;  %530 = vmax.xlane.f32.xlu1 %v529_v57  ;;  %v370_v59 = vpop.xlane.xlu2 %369 }
 0x2cb   :  { %692 = vmax.xlane.f32.xlu2 %v691_v58  ;;  %v374_v61 = vsub.f32 %v2419_v11, %v370_v59 }
 0x2cd   :  { %v2484_v60 = vpop.eup %1910  ;;  %v381_v3 = vmul.f32 1.442695, %v374_v61 }
 0x2ce   :  { %v389_v2 = vsel %vm358_vm3, %v2484_v60, 0.0 }
 0x2cf   :  { %1912 = vpow2.f32 %v381_v3 }
 0x2d0   :  { %v2487_v62 = vpop.f32.mrf.mxu3  ;;  %v2489_v63 = vpop.f32.mrf.mxu2 }
 0x2d1   :  { %v697_v1 = vsel %vm358_vm3, %v2487_v62, -inf  ;;  %v862_v6 = vsel %vm358_vm3, %v2489_v63, -inf }
 0x2d2   :  { %695 = vmax.xlane.f32.xlu0 %v694_v0  ;;  %698 = vmax.xlane.f32.xlu1 %v697_v1 }
 0x2d3   :  { %390 = vadd.xlane.f32.xlu2 %v389_v2 }
 0x2d5   :  { %v2507_v9 = vpop.eup %1912 }
 0x2d6   :  { %v392_v13 = vsel %vm358_vm3, %v2507_v9, 0.0 }
 0x2d8   :  { %v2497_v4 = vpop.f32.mrf.mxu3  ;;  %v2499_v5 = vpop.f32.mrf.mxu2 }
 0x2d9   :  { %v865_v7 = vsel %vm358_vm3, %v2499_v5, -inf  ;;  %v700_v8 = vsel %vm358_vm3, %v2497_v4, -inf }
 0x2da   :  { %863 = vmax.xlane.f32.xlu0 %v862_v6  ;;  %866 = vmax.xlane.f32.xlu1 %v865_v7 }
 0x2db   :  { %701 = vmax.xlane.f32.xlu2 %v700_v8 }
 0x2e0   :  { %v2509_v10 = vpop.f32.mrf.mxu3  ;;  %v2511_v11 = vpop.f32.mrf.mxu2 }
 0x2e1   :  { %v868_v12 = vsel %vm358_vm3, %v2509_v10, -inf  ;;  %v1033_v19 = vsel %vm358_vm3, %v2511_v11, -inf }
 0x2e2   :  { %869 = vmax.xlane.f32.xlu1 %v868_v12  ;;  %393 = vadd.xlane.f32.xlu0 %v392_v13 }
 0x2e8   :  { %v2517_v14 = vpop.f32.mrf.mxu3  ;;  %v2519_v15 = vpop.f32.mrf.mxu2 }
 0x2e9   :  { %v1036_v16 = vsel %vm358_vm3, %v2519_v15, -inf  ;;  %v871_v17 = vsel %vm358_vm3, %v2517_v14, -inf }
 0x2ea   :  { %1037 = vmax.xlane.f32.xlu1 %v1036_v16  ;;  %872 = vmax.xlane.f32.xlu2 %v871_v17 }
 0x2eb   :  { %1034 = vmax.xlane.f32.xlu0 %v1033_v19 }
 0x2f0   :  { %v2527_v20 = vpop.f32.mrf.mxu3 }
 0x2f1   :  { %v2529_v21 = vpop.f32.mrf.mxu2  ;;  %v1039_v22 = vsel %vm358_vm3, %v2527_v20, -inf }
 0x2f2   :  { %v1204_v23 = vsel %vm358_vm3, %v2529_v21, -inf }
 0x2f3   :  { %1205 = vmax.xlane.f32.xlu2 %v1204_v23  ;;  %1040 = vmax.xlane.f32.xlu0 %v1039_v22 }
 0x2f8   :  { %v2535_v24 = vpop.f32.mrf.mxu3 }
 0x2f9   :  { %v2537_v25 = vpop.f32.mrf.mxu2  ;;  %v1042_v26 = vsel %vm358_vm3, %v2535_v24, -inf }
 0x2fa   :  { %1043 = vmax.xlane.f32.xlu1 %v1042_v26  ;;  %v1207_v34 = vsel %vm358_vm3, %v2537_v25, -inf }
 0x2fb   :  { %1208 = vmax.xlane.f32.xlu0 %v1207_v34 }
 0x300   :  { %v2543_v36 = vpop.f32.mrf.mxu3 }
 0x301   :  { %v2545_v37 = vpop.f32.mrf.mxu2  ;;  %v1210_v38 = vsel %vm358_vm3, %v2543_v36, -inf }
 0x302   :  { %v1375_v42 = vsel %vm358_vm3, %v2545_v37, -inf  ;;  %1211 = vmax.xlane.f32.xlu2 %v1210_v38 }
 0x303   :  { %1376 = vmax.xlane.f32.xlu1 %v1375_v42 }
 0x308   :  { %v2551_v44 = vpop.f32.mrf.mxu3 }
 0x309   :  { %v2553_v45 = vpop.f32.mrf.mxu2  ;;  %v1213_v46 = vsel %vm358_vm3, %v2551_v44, -inf }
 0x30a   :  { %v1378_v41 = vsel %vm358_vm3, %v2553_v45, -inf  ;;  %1214 = vmax.xlane.f32.xlu0 %v1213_v46 }
 0x30b   :  { %1379 = vmax.xlane.f32.xlu2 %v1378_v41 }
 0x310   :  { %v2559_v49 = vpop.f32.mrf.mxu3 }
 0x311   :  { %v2561_v50 = vpop.f32.mrf.mxu2  ;;  %v1381_v51 = vsel %vm358_vm3, %v2559_v49, -inf }
 0x312   :  { %1382 = vmax.xlane.f32.xlu1 %v1381_v51  ;;  %v1546_v52 = vsel %vm358_vm3, %v2561_v50, -inf }
 0x313   :  { %1547 = vmax.xlane.f32.xlu0 %v1546_v52 }
 0x318   :  { %v2567_v56 = vpop.f32.mrf.mxu3 }
 0x319   :  { %v1384_v57 = vsel %vm358_vm3, %v2567_v56, -inf  ;;  %v2571_v58 = vpop.f32.mrf.mxu2 }
 0x31a   :  { %1385 = vmax.xlane.f32.xlu1 %v1384_v57  ;;  %v1549_v61 = vsel %vm358_vm3, %v2571_v58, -inf }
 0x320   :  { %v2573_v59 = vpop.f32.mrf.mxu3 }
 0x321   :  { %v1552_v0 = vsel %vm358_vm3, %v2573_v59, -inf }
 0x322   :  { %1550 = vmax.xlane.f32.xlu1 %v1549_v61  ;;  %1553 = vmax.xlane.f32.xlu2 %v1552_v0 }
 0x325   :  { %v522_v1 = vpop.xlane.xlu1 %521 }
 0x326   :  { %v532_v2 = vsub.f32 %v2447_v33, %v522_v1 }
 0x328   :  { %v536_v3 = vmul.f32 1.442695, %v532_v2  ;;  %v2580_v6 = vpop.f32.mrf.mxu3 }
 0x329   :  { %v1555_v7 = vsel %vm358_vm3, %v2580_v6, -inf }
 0x32a   :  { %1914 = vpow2.f32 %v536_v3  ;;  %1556 = vmax.xlane.f32.xlu1 %v1555_v7 }
 0x32d   :  { %v525_v8 = vpop.xlane.xlu2 %524 }
 0x32e   :  { %v533_v12 = vsub.f32 %v2454_v32, %v525_v8 }
 0x330   :  { %v2585_v13 = vpop.eup %1914  ;;  %v538_v16 = vmul.f32 1.442695, %v533_v12 }
 0x331   :  { %v544_v17 = vsel %vm358_vm3, %v2585_v13, 0.0 }
 0x332   :  { %1916 = vpow2.f32 %v538_v16  ;;  %545 = vadd.xlane.f32.xlu1 %v544_v17 }
 0x335   :  { %v528_v33 = vpop.xlane.xlu0 %527  ;;  %v385_v19 = vpop.xlane.xlu2 %384 }
 0x336   :  { %v534_v22 = vsub.f32 %v2463_v39, %v528_v33  ;;  %1918 = vrcp.f32 %v385_v19 }
 0x338   :  { %v2590_v23 = vpop.eup %1916  ;;  %v540_v26 = vmul.f32 1.442695, %v534_v22 }
 0x339   :  { %v547_v34 = vsel %vm358_vm3, %v2590_v23, 0.0 }
 0x33a   :  { %1920 = vpow2.f32 %v540_v26  ;;  %548 = vadd.xlane.f32.xlu2 %v547_v34 }
 0x33c   :  { %v1919_v42 = vpop.eup %1918 }
 0x33d   :  { %v388_v32 = vpop.xlane.xlu0 %387  ;;  %v531_v38 = vpop.xlane.xlu1 %530  ;;  %v399_v57 = vmul.f32 %v1919_v42, %v2461_v47 }
 0x33e   :  { %1922 = vrcp.f32 %v388_v32  ;;  %v535_v46 = vsub.f32 %v2474_v54, %v531_v38  ;;  %v693_v41 = vpop.xlane.xlu2 %692 }
 0x33f   :  { %v703_v51 = vsub.f32 %v2465_v40, %v693_v41  ;;  %v403_v2 = vpack.c.bf16 %v399_v57, %v399_v57 }
 0x340   :  { %v2596_v52 = vpop.eup %1920  ;;  %v542_v39 = vmul.f32 1.442695, %v535_v46 }
 0x341   :  { %v707_v61 = vmul.f32 1.442695, %v703_v51  ;;  %v550_v0 = vsel %vm358_vm3, %v2596_v52, 0.0  ;;  %v409_v33 = vunpack.c.l.b16 %v403_v2 }
 0x342   :  { %1924 = vpow2.f32 %v542_v39  ;;  %551 = vadd.xlane.f32.xlu2 %v550_v0 }
 0x343   :  { %1926 = vpow2.f32 %v707_v61 }
 0x344   :  { %v1923_v1 = vpop.eup %1922 }
 0x345   :  { %v400_v3 = vmul.f32 %v1923_v1, %v2472_v53  ;;  %v696_v54 = vpop.xlane.xlu0 %695  ;;  %v2602_v7 = vpop.xlane.xlu1 %698 }
 0x346   :  { %v704_v40 = vsub.f32 %v2476_v55, %v696_v54  ;;  %v391_v8 = vpop.xlane.xlu2 %390 }
 0x347   :  { %v404_v12 = vpack.c.bf16 %v400_v3, %v400_v3 }
 0x348   :  { %v2605_v16 = vpop.eup %1924  ;;  %v709_v47 = vmul.f32 1.442695, %v704_v40 }
 0x349   :  { %v2607_v17 = vpop.eup %1926  ;;  %v410_v19 = vunpack.c.l.b16 %v404_v12  ;;  %v553_v22 = vsel %vm358_vm3, %v2605_v16, 0.0 }
 0x34a   :  { %1928 = vpow2.f32 %v709_v47  ;;  %554 = vadd.xlane.f32.xlu0 %v553_v22  ;;  %v715_v53 = vsel %vm358_vm3, %v2607_v17, 0.0 }
 0x34b   :  { %716 = vadd.xlane.f32.xlu2 %v715_v53  ;;  %v411_v26 = vpack.c.b16 %v410_v19, %v409_v33  ;;  %1930 = vrcp.f32 %v391_v8 }
 0x34d   :  { %v864_v55 = vpop.xlane.xlu0 %863  ;;  %v867_v34 = vpop.xlane.xlu1 %866  ;;  %1811 = vmatmul.msk.bf16.vlgmr.msrb.gmra.mxu0 %vm358_vm3, %v411_v26 }
 0x34e   :  { %v874_v32 = vsub.f32 %v2489_v63, %v864_v55  ;;  %757 = vmatpush.bf16.msrb.mxu0 %v2439_v27  ;;  %v702_v38 = vpop.xlane.xlu2 %701  ;;  %v875_v51 = vsub.f32 %v2499_v5, %v867_v34 }
 0x34f   :  { %v706_v42 = vsub.f32 %v2497_v4, %v702_v38 }
 0x350   :  { %v2617_v46 = vpop.eup %1928  ;;  %v878_v41 = vmul.f32 1.442695, %v874_v32  ;;  %v880_v61 = vmul.f32 1.442695, %v875_v51 }
 0x351   :  { %v713_v39 = vmul.f32 1.442695, %v706_v42  ;;  %v718_v57 = vsel %vm358_vm3, %v2617_v46, 0.0  ;;  %v1931_v27 = vpop.eup %1930 }
 0x352   :  { %1932 = vpow2.f32 %v878_v41  ;;  %719 = vadd.xlane.f32.xlu0 %v718_v57  ;;  %v401_v2 = vmul.f32 %v1931_v27, %v2484_v60 }
 0x353   :  { %1934 = vpow2.f32 %v713_v39 }
 0x354   :  { %v405_v12 = vpack.c.bf16 %v401_v2, %v401_v2 }
 0x355   :  { %v870_v63 = vpop.xlane.xlu1 %869  ;;  %v394_v0 = vpop.xlane.xlu0 %393 }
 0x356   :  { %1936 = vrcp.f32 %v394_v0  ;;  %v876_v4 = vsub.f32 %v2509_v10, %v870_v63  ;;  %v437_v22 = vunpack.c.l.b16 %v405_v12 }
 0x357   :  { %1938 = vpow2.f32 %v880_v61 }
 0x358   :  { %v2622_v1 = vpop.eup %1932  ;;  %v882_v8 = vmul.f32 1.442695, %v876_v4 }
 0x359   :  { %v886_v5 = vsel %vm358_vm3, %v2622_v1, 0.0  ;;  %v2628_v3 = vpop.eup %1934 }
 0x35a   :  { %887 = vadd.xlane.f32.xlu1 %v886_v5  ;;  %v724_v54 = vsel %vm358_vm3, %v2628_v3, 0.0  ;;  %1940 = vpow2.f32 %v882_v8  ;;  %v705_v5 = vsub.f32 %v2487_v62, %v2602_v7 }
 0x35b   :  { %725 = vadd.xlane.f32.xlu2 %v724_v54 }
 0x35c   :  { %v1937_v40 = vpop.eup %1936 }
 0x35d   :  { %v402_v47 = vmul.f32 %v1937_v40, %v2507_v9  ;;  %v873_v33 = vpop.xlane.xlu2 %872  ;;  %v2633_v19 = vpop.eup %1938  ;;  %v711_v40 = vmul.f32 1.442695, %v705_v5 }
 0x35e   :  { %v877_v60 = vsub.f32 %v2517_v14, %v873_v33  ;;  %v889_v26 = vsel %vm358_vm3, %v2633_v19, 0.0  ;;  %v1035_v55 = vpop.xlane.xlu0 %1034  ;;  %v1038_v38 = vpop.xlane.xlu1 %1037 }
 0x35f   :  { %v406_v10 = vpack.c.bf16 %v402_v47, %v402_v47  ;;  %v1046_v14 = vsub.f32 %v2519_v15, %v1038_v38 }
 0x360   :  { %v884_v32 = vmul.f32 1.442695, %v877_v60  ;;  %v2639_v9 = vpop.eup %1940 }
 0x361   :  { %v438_v53 = vunpack.c.l.b16 %v406_v10  ;;  %v892_v42 = vsel %vm358_vm3, %v2639_v9, 0.0  ;;  %v1051_v41 = vmul.f32 1.442695, %v1046_v14 }
 0x362   :  { %890 = vadd.xlane.f32.xlu1 %v889_v26  ;;  %1942 = vpow2.f32 %v884_v32 }
 0x363   :  { %v439_v34 = vpack.c.b16 %v438_v53, %v437_v22  ;;  %1944 = vpow2.f32 %v1051_v41 }
 0x365   :  { %1812 = vmatmul.msk.bf16.vlgmr.msrb.gmra.mxu1 %vm358_vm3, %v439_v34 }
 0x366   :  { %782 = vmatpush.bf16.msrb.mxu1 %v2458_v43  ;;  %1282 = vrot.lane.b32.xlu0 %v2371_v48, %s2203_s7  ;;  %v1041_v51 = vpop.xlane.xlu0 %1040  ;;  %v1206_v47 = vpop.xlane.xlu2 %1205 }
 0x367   :  { %v1047_v61 = vsub.f32 %v2527_v20, %v1041_v51  ;;  %v1216_v62 = vsub.f32 %v2529_v21, %v1206_v47 }
 0x368   :  { %v2647_v57 = vpop.eup %1942 }
 0x369   :  { %v895_v43 = vsel %vm358_vm3, %v2647_v57, 0.0  ;;  %v1053_v63 = vmul.f32 1.442695, %v1047_v61  ;;  %v2654_v15 = vpop.eup %1944  ;;  %v1220_v34 = vmul.f32 1.442695, %v1216_v62 }
 0x36a   :  { %893 = vadd.xlane.f32.xlu1 %v892_v42  ;;  %v1060_v4 = vsel %vm358_vm3, %v2654_v15, 0.0 }
 0x36b   :  { %1946 = vpow2.f32 %v1053_v63 }
 0x36d   :  { %v1044_v39 = vpop.xlane.xlu1 %1043 }
 0x36e   :  { %v1209_v7 = vpop.xlane.xlu0 %1208  ;;  %v1048_v21 = vsub.f32 %v2535_v24, %v1044_v39 }
 0x36f   :  { %v1217_v53 = vsub.f32 %v2537_v25, %v1209_v7 }
 0x370   :  { %v1055_v51 = vmul.f32 1.442695, %v1048_v21 }
 0x371   :  { %v2659_v20 = vpop.eup %1946  ;;  %v1222_v38 = vmul.f32 1.442695, %v1217_v53 }
 0x372   :  { %896 = vadd.xlane.f32.xlu1 %v895_v43  ;;  %v1063_v54 = vsel %vm358_vm3, %v2659_v20, 0.0 }
 0x373   :  { %1428 = vrot.lane.b32.xlu2 %v2356_v30, %s2205_s9 }
 0x375   :  { %v1212_v32 = vpop.xlane.xlu2 %1211 }
 0x376   :  { %v1377_v0 = vpop.xlane.xlu1 %1376 }
 0x377   :  { %v1387_v27 = vsub.f32 %v2545_v37, %v1377_v0  ;;  %v1045_v37 = vsub.f32 %v2511_v11, %v1035_v55 }
 0x379   :  { %v1391_v2 = vmul.f32 1.442695, %v1387_v27  ;;  %v1049_v10 = vmul.f32 1.442695, %v1045_v37 }
 0x37a   :  { %1061 = vadd.xlane.f32.xlu1 %v1060_v4 }
 0x37b   :  { %1948 = vpow2.f32 %v1391_v2 }
 0x37c   :  { %1950 = vpow2.f32 %v711_v40 }
 0x37d   :  { %1952 = vpow2.f32 %v1049_v10  ;;  %v1215_v14 = vpop.xlane.xlu0 %1214 }
 0x37e   :  { %v1219_v25 = vsub.f32 %v2551_v44, %v1215_v14  ;;  %v1218_v44 = vsub.f32 %v2543_v36, %v1212_v32 }
 0x380   :  { %v1226_v39 = vmul.f32 1.442695, %v1219_v25 }
 0x381   :  { %v2667_v12 = vpop.eup %1948 }
 0x382   :  { %1064 = vadd.xlane.f32.xlu1 %v1063_v54  ;;  %v1399_v33 = vsel %vm358_vm3, %v2667_v12, 0.0  ;;  %v2673_v60 = vpop.eup %1950  ;;  %v1224_v54 = vmul.f32 1.442695, %v1218_v44 }
 0x383   :  { %v721_v11 = vsel %vm358_vm3, %v2673_v60, 0.0  ;;  %v2680_v42 = vpop.eup %1952 }
 0x384   :  { %v1057_v61 = vsel %vm358_vm3, %v2680_v42, 0.0 }
 0x385   :  { %v2665_v8 = vpop.xlane.xlu1 %1382 }
 0x386   :  { %v1548_v47 = vpop.xlane.xlu0 %1547 }
 0x387   :  { %v1558_v62 = vsub.f32 %v2561_v50, %v1548_v47 }
 0x38a   :  { %1400 = vadd.xlane.f32.xlu1 %v1399_v33 }
 0x38d   :  { %v1386_v22 = vpop.xlane.xlu1 %1385 }
 0x38e   :  { %v1390_v26 = vsub.f32 %v2567_v56, %v1386_v22  ;;  %v1389_v22 = vsub.f32 %v2559_v49, %v2665_v8 }
 0x390   :  { %v1397_v55 = vmul.f32 1.442695, %v1390_v26  ;;  %722 = vadd.xlane.f32.xlu0 %v721_v11 }
 0x392   :  { %1954 = vpow2.f32 %v1397_v55  ;;  %v1395_v55 = vmul.f32 1.442695, %v1389_v22 }
 0x393   :  { %1956 = vpow2.f32 %v1220_v34  ;;  %v1562_v34 = vmul.f32 1.442695, %v1558_v62 }
 0x394   :  { %1958 = vpow2.f32 %v1222_v38 }
 0x395   :  { %v1551_v41 = vpop.xlane.xlu1 %1550 }
 0x396   :  { %v1559_v56 = vsub.f32 %v2571_v58, %v1551_v41  ;;  %v1380_v58 = vpop.xlane.xlu2 %1379 }
 0x397   :  { %v1388_v5 = vsub.f32 %v2553_v45, %v1380_v58 }
 0x398   :  { %v2686_v43 = vpop.eup %1954  ;;  %v1564_v63 = vmul.f32 1.442695, %v1559_v56  ;;  %1058 = vadd.xlane.f32.xlu0 %v1057_v61 }
 0x399   :  { %v2688_v0 = vpop.eup %1956  ;;  %v1408_v24 = vsel %vm358_vm3, %v2686_v43, 0.0  ;;  %v1393_v10 = vmul.f32 1.442695, %v1388_v5 }
 0x39a   :  { %1960 = vpow2.f32 %v1564_v63  ;;  %1409 = vadd.xlane.f32.xlu1 %v1408_v24  ;;  %v2693_v27 = vpop.eup %1958  ;;  %v1228_v4 = vsel %vm358_vm3, %v2688_v0, 0.0 }
 0x39b   :  { %1962 = vpow2.f32 %v1055_v51  ;;  %v1231_v40 = vsel %vm358_vm3, %v2693_v27, 0.0 }
 0x39c   :  { %1229 = vadd.xlane.f32.xlu2 %v1228_v4  ;;  %1964 = vpow2.f32 %v1226_v39 }
 0x39d   :  { %v1557_v2 = vpop.xlane.xlu1 %1556  ;;  %1966 = vpow2.f32 %v1224_v54 }
 0x39e   :  { %v2713_v53 = vpop.xlane.xlu2 %1553  ;;  %1968 = vpow2.f32 %v1393_v10  ;;  %v1561_v32 = vsub.f32 %v2580_v6, %v1557_v2 }
 0x3a0   :  { %v2700_v37 = vpop.eup %1960  ;;  %1232 = vadd.xlane.f32.xlu0 %v1231_v40  ;;  %v1568_v14 = vmul.f32 1.442695, %v1561_v32 }
 0x3a1   :  { %v2702_v36 = vpop.eup %1962  ;;  %v1573_v33 = vsel %vm358_vm3, %v2700_v37, 0.0 }
 0x3a2   :  { %1574 = vadd.xlane.f32.xlu1 %v1573_v33  ;;  %v2707_v7 = vpop.eup %1964  ;;  %v1066_v45 = vsel %vm358_vm3, %v2702_v36, 0.0 }
 0x3a3   :  { %v1237_v11 = vsel %vm358_vm3, %v2707_v7, 0.0  ;;  %v2717_v50 = vpop.eup %1966 }
 0x3a4   :  { %1067 = vadd.xlane.f32.xlu2 %v1066_v45  ;;  %v2720_v38 = vpop.eup %1968  ;;  %v1234_v49 = vsel %vm358_vm3, %v2717_v50, 0.0 }
 0x3a5   :  { %v546_v26 = vpop.xlane.xlu1 %545  ;;  %v1402_v41 = vsel %vm358_vm3, %v2720_v38, 0.0 }
 0x3a6   :  { %1970 = vrcp.f32 %v546_v26 }
 0x3a7   :  { %1972 = vpow2.f32 %v1562_v34 }
 0x3a8   :  { %1238 = vadd.xlane.f32.xlu0 %v1237_v11  ;;  %1974 = vpow2.f32 %v1395_v55 }
 0x3ac   :  { %1235 = vadd.xlane.f32.xlu2 %v1234_v49  ;;  %v1971_v21 = vpop.eup %1970 }
 0x3ad   :  { %v549_v8 = vpop.xlane.xlu2 %548  ;;  %v2726_v25 = vpop.eup %1972  ;;  %v560_v56 = vmul.f32 %v1971_v21, %v2585_v13 }
 0x3ae   :  { %1976 = vrcp.f32 %v549_v8  ;;  %v2729_v6 = vpop.eup %1974  ;;  %v1570_v61 = vsel %vm358_vm3, %v2726_v25, 0.0 }
 0x3af   :  { %1978 = vpow2.f32 %v1568_v14  ;;  %v564_v63 = vpack.c.bf16 %v560_v56, %v560_v56  ;;  %v1405_v58 = vsel %vm358_vm3, %v2729_v6, 0.0 }
 0x3b0   :  { %1403 = vadd.xlane.f32.xlu0 %v1402_v41 }
 0x3b1   :  { %v570_v13 = vunpack.c.l.b16 %v564_v63 }
 0x3b4   :  { %v1977_v51 = vpop.eup %1976  ;;  %1571 = vadd.xlane.f32.xlu2 %v1570_v61  ;;  %v1560_v61 = vsub.f32 %v2573_v59, %v2713_v53 }
 0x3b5   :  { %v561_v24 = vmul.f32 %v1977_v51, %v2590_v23  ;;  %v552_v39 = vpop.xlane.xlu2 %551  ;;  %v2736_v4 = vpop.eup %1978 }
 0x3b6   :  { %1980 = vrcp.f32 %v552_v39  ;;  %v1579_v54 = vsel %vm358_vm3, %v2736_v4, 0.0 }
 0x3b7   :  { %v565_v44 = vpack.c.bf16 %v561_v24, %v561_v24 }
 0x3b8   :  { %1406 = vadd.xlane.f32.xlu0 %v1405_v58 }
 0x3b9   :  { %v571_v2 = vunpack.c.l.b16 %v565_v44 }
 0x3bb   :  { %v572_v5 = vpack.c.b16 %v571_v2, %v570_v13  ;;  %1453 = vrot.lane.b32.xlu1 %v2371_v48, %s2205_s9 }
 0x3bc   :  { %1580 = vadd.xlane.f32.xlu2 %v1579_v54  ;;  %v1981_v40 = vpop.eup %1980 }
 0x3bd   :  { %v555_v23 = vpop.xlane.xlu0 %554  ;;  %1815 = vmatmul.msk.bf16.vlgmr.msra.gmra.mxu0 %vm358_vm3, %v572_v5  ;;  %v562_v33 = vmul.f32 %v1981_v40, %v2596_v52 }
 0x3be   :  { %1982 = vrcp.f32 %v555_v23  ;;  %928 = vmatpush.bf16.msra.mxu0 %v2443_v29  ;;  %v717_v47 = vpop.xlane.xlu2 %716 }
 0x3bf   :  { %1984 = vrcp.f32 %v717_v47  ;;  %v566_v62 = vpack.c.bf16 %v562_v33, %v562_v33 }
 0x3c1   :  { %v595_v11 = vunpack.c.l.b16 %v566_v62 }
 0x3c4   :  { %v1983_v10 = vpop.eup %1982 }
 0x3c5   :  { %v563_v45 = vmul.f32 %v1983_v10, %v2605_v16  ;;  %v720_v22 = vpop.xlane.xlu0 %719  ;;  %v1985_v26 = vpop.eup %1984 }
 0x3c6   :  { %1986 = vrcp.f32 %v720_v22  ;;  %v731_v32 = vmul.f32 %v1985_v26, %v2607_v17 }
 0x3c7   :  { %v567_v34 = vpack.c.bf16 %v563_v45, %v563_v45 }
 0x3c8   :  { %v735_v52 = vpack.c.bf16 %v731_v32, %v731_v32 }
 0x3c9   :  { %v596_v55 = vunpack.c.l.b16 %v567_v34 }
 0x3ca   :  { %v430_v49 = vpop.f32.mrf.mxu0  ;;  %v741_v17 = vunpack.c.l.b16 %v735_v52 }
 0x3cb   :  { %v597_v8 = vpack.c.b16 %v596_v55, %v595_v11  ;;  %v463_v29 = vpack.c.bf16 %v430_v49, %v430_v49 }
 0x3cc   :  { %v1987_v21 = vpop.eup %1986  ;;  %1599 = vrot.lane.b32.xlu0 %v2356_v30, %s2207_s1 }
 0x3cd   :  { %v732_v14 = vmul.f32 %v1987_v21, %v2617_v46  ;;  %468 = vst.msk [vmem:[#allocation2] sm:$0xf] %vm467_vm4, %v463_v29  ;;  %v888_v16 = vpop.xlane.xlu1 %887  ;;  %1816 = vmatmul.msk.bf16.vlgmr.msra.gmra.mxu1 %vm358_vm3, %v597_v8 }
 0x3ce   :  { %953 = vmatpush.bf16.msra.mxu1 %v2445_v31  ;;  %1988 = vrcp.f32 %v888_v16  ;;  %v1566_v31 = vmul.f32 1.442695, %v1560_v61  ;;  %v726_v33 = vpop.xlane.xlu2 %725 }
 0x3cf   :  { %v736_v41 = vpack.c.bf16 %v732_v14, %v732_v14 }
 0x3d1   :  { %v742_v56 = vunpack.c.l.b16 %v736_v41 }
 0x3d2   :  { %v432_v51 = vpop.f32.mrf.mxu0 }
 0x3d3   :  { %v743_v63 = vpack.c.b16 %v742_v56, %v741_v17  ;;  %v464_v30 = vpack.c.bf16 %v432_v51, %v432_v51 }
 0x3d4   :  { %1624 = vrot.lane.b32.xlu2 %v2371_v48, %s2207_s1  ;;  %v1989_v24 = vpop.eup %1988 }
 0x3d5   :  { %469 = vst.msk [vmem:[#allocation2 + $0x4] sm:$0xf] %vm467_vm4, %v464_v30  ;;  %v891_v46 = vpop.xlane.xlu1 %890  ;;  %1819 = vmatmul.msk.bf16.vlgmr.msrb.gmra.mxu0 %vm358_vm3, %v743_v63  ;;  %v902_v39 = vmul.f32 %v1989_v24, %v2622_v1 }
 0x3d6   :  { %1990 = vrcp.f32 %v891_v46  ;;  %1099 = vmatpush.bf16.msrb.mxu0 %v2427_v18  ;;  %v1429_v34 = vpop.permute.xlu2 %1428 }
 0x3d7   :  { %1992 = vpow2.f32 %v1566_v31  ;;  %v906_v59 = vpack.c.bf16 %v902_v39, %v902_v39 }
 0x3d8   :  { %v2770_v10 = vpop.permute.xlu0 %1282  ;;  %1994 = vrcp.f32 %v726_v33 }
 0x3d9   :  { %v912_v2 = vunpack.c.l.b16 %v906_v59 }
 0x3dc   :  { %v1991_v44 = vpop.eup %1990 }
 0x3dd   :  { %v903_v53 = vmul.f32 %v1991_v44, %v2633_v19  ;;  %v2762_v13 = vpop.eup %1992  ;;  %v894_v19 = vpop.xlane.xlu1 %893 }
 0x3de   :  { %v1576_v40 = vsel %vm358_vm3, %v2762_v13, 0.0  ;;  %v1995_v22 = vpop.eup %1994 }
 0x3df   :  { %v907_v58 = vpack.c.bf16 %v903_v53, %v903_v53  ;;  %v734_v26 = vmul.f32 %v1995_v22, %v2628_v3 }
 0x3e1   :  { %v913_v48 = vunpack.c.l.b16 %v907_v58 }
 0x3e2   :  { %v458_v5 = vpop.f32.mrf.mxu1 }
 0x3e3   :  { %v914_v54 = vpack.c.b16 %v913_v48, %v912_v2  ;;  %v465_v23 = vpack.c.bf16 %v458_v5, %v458_v5 }
 0x3e5   :  { %470 = vst.msk [vmem:[#allocation2 + $0x8] sm:$0xf] %vm467_vm4, %v465_v23  ;;  %1577 = vadd.xlane.f32.xlu1 %v1576_v40  ;;  %1823 = vmatmul.msk.bf16.vlgmr.msra.gmra.mxu0 %vm358_vm3, %v914_v54  ;;  %v897_v47 = vpop.xlane.xlu1 %896 }
 0x3e6   :  { %1270 = vmatpush.bf16.msra.mxu0 %v2441_v28  ;;  %v738_v28 = vpack.c.bf16 %v734_v26, %v734_v26 }
 0x3e8   :  { %v767_v29 = vunpack.c.l.b16 %v738_v28 }
 0x3ea   :  { %v460_v18 = vpop.f32.mrf.mxu1 }
 0x3eb   :  { %v466_v1 = vpack.c.bf16 %v460_v18, %v460_v18 }
 0x3ed   :  { %471 = vst.msk [vmem:[#allocation2 + $0xc] sm:$0xf] %vm467_vm4, %v466_v1  ;;  %v1062_v62 = vpop.xlane.xlu1 %1061 }
 0x3f5   :  { %v1065_v52 = vpop.xlane.xlu1 %1064 }
 0x3fd   :  { %v1401_v39 = vpop.xlane.xlu1 %1400 }
 0x403   :  { %v723_v45 = vpop.xlane.xlu0 %722 }
 0x404   :  { %1996 = vrcp.f32 %v723_v45 }
 0x405   :  { %1998 = vrcp.f32 %v1062_v62 }
 0x406   :  { %2000 = vrcp.f32 %v897_v47 }
 0x40a   :  { %v1997_v11 = vpop.eup %1996 }
 0x40b   :  { %v733_v55 = vmul.f32 %v1997_v11, %v2673_v60  ;;  %v1059_v32 = vpop.xlane.xlu0 %1058  ;;  %v1999_v49 = vpop.eup %1998 }
 0x40c   :  { %2002 = vrcp.f32 %v1059_v32  ;;  %v1074_v21 = vmul.f32 %v1999_v49, %v2654_v15  ;;  %v2001_v41 = vpop.eup %2000 }
 0x40d   :  { %v737_v8 = vpack.c.bf16 %v733_v55, %v733_v55  ;;  %2004 = vrcp.f32 %v894_v19  ;;  %v905_v63 = vmul.f32 %v2001_v41, %v2647_v57  ;;  %v1410_v54 = vpop.xlane.xlu1 %1409 }
 0x40e   :  { %v1078_v56 = vpack.c.bf16 %v1074_v21, %v1074_v21 }
 0x40f   :  { %v766_v14 = vunpack.c.l.b16 %v737_v8  ;;  %v1230_v16 = vpop.xlane.xlu2 %1229  ;;  %v909_v31 = vpack.c.bf16 %v905_v63, %v905_v63 }
 0x410   :  { %v1084_v46 = vunpack.c.l.b16 %v1078_v56 }
 0x411   :  { %v768_v17 = vpack.c.b16 %v767_v29, %v766_v14 }
 0x412   :  { %v2003_v3 = vpop.eup %2002 }
 0x413   :  { %v1073_v51 = vmul.f32 %v2003_v3, %v2680_v42  ;;  %v1233_v61 = vpop.xlane.xlu0 %1232  ;;  %1820 = vmatmul.msk.bf16.vlgmr.msrb.gmra.mxu1 %vm358_vm3, %v768_v17  ;;  %v2005_v60 = vpop.eup %2004 }
 0x414   :  { %2006 = vrcp.f32 %v1233_v61  ;;  %1124 = vmatpush.bf16.msrb.mxu1 %v2451_v35  ;;  %v904_v15 = vmul.f32 %v2005_v60, %v2639_v9  ;;  %v938_v35 = vunpack.c.l.b16 %v909_v31 }
 0x415   :  { %v1077_v30 = vpack.c.bf16 %v1073_v51, %v1073_v51  ;;  %2008 = vrcp.f32 %v1230_v16  ;;  %v1575_v11 = vpop.xlane.xlu1 %1574 }
 0x416   :  { %v908_v53 = vpack.c.bf16 %v904_v15, %v904_v15 }
 0x417   :  { %v1083_v24 = vunpack.c.l.b16 %v1077_v30  ;;  %v1068_v59 = vpop.xlane.xlu2 %1067 }
 0x418   :  { %2010 = vrcp.f32 %v1068_v59  ;;  %v937_v48 = vunpack.c.l.b16 %v908_v53 }
 0x419   :  { %v1085_v44 = vpack.c.b16 %v1084_v46, %v1083_v24  ;;  %2012 = vrcp.f32 %v1065_v52 }
 0x41a   :  { %v2007_v42 = vpop.eup %2006  ;;  %v939_v5 = vpack.c.b16 %v938_v35, %v937_v48 }
 0x41b   :  { %v1239_v58 = vpop.xlane.xlu0 %1238  ;;  %1827 = vmatmul.msk.bf16.vlgmr.msrb.gmra.mxu0 %vm358_vm3, %v1085_v44  ;;  %v2009_v2 = vpop.eup %2008  ;;  %v1245_v57 = vmul.f32 %v2007_v42, %v2693_v27 }
 0x41c   :  { %1441 = vmatpush.bf16.msrb.mxu0 %v1429_v34  ;;  %v1244_v9 = vmul.f32 %v2009_v2, %v2688_v0 }
 0x41d   :  { %v1249_v23 = vpack.c.bf16 %v1245_v57, %v1245_v57 }
 0x41e   :  { %v2011_v40 = vpop.eup %2010  ;;  %v1248_v18 = vpack.c.bf16 %v1244_v9, %v1244_v9 }
 0x41f   :  { %v2013_v19 = vpop.eup %2012  ;;  %v1255_v47 = vunpack.c.l.b16 %v1249_v23  ;;  %v1076_v33 = vmul.f32 %v2011_v40, %v2702_v36  ;;  %v1236_v27 = vpop.xlane.xlu2 %1235 }
 0x420   :  { %v1075_v62 = vmul.f32 %v2013_v19, %v2659_v20  ;;  %v1254_v0 = vunpack.c.l.b16 %v1248_v18 }
 0x421   :  { %v1080_v22 = vpack.c.bf16 %v1076_v33, %v1076_v33 }
 0x422   :  { %v1256_v45 = vpack.c.b16 %v1255_v47, %v1254_v0  ;;  %v1079_v34 = vpack.c.bf16 %v1075_v62, %v1075_v62 }
 0x423   :  { %v1404_v1 = vpop.xlane.xlu0 %1403  ;;  %1824 = vmatmul.msk.bf16.vlgmr.msra.gmra.mxu1 %vm358_vm3, %v939_v5  ;;  %v1109_v55 = vunpack.c.l.b16 %v1080_v22 }
 0x424   :  { %2014 = vrcp.f32 %v1404_v1  ;;  %1295 = vmatpush.bf16.msra.mxu1 %v2770_v10  ;;  %v1108_v32 = vunpack.c.l.b16 %v1079_v34 }
 0x425   :  { %2016 = vrcp.f32 %v1401_v39 }
 0x426   :  { %2018 = vrcp.f32 %v1236_v27  ;;  %v1110_v8 = vpack.c.b16 %v1109_v55, %v1108_v32 }
 0x427   :  { %2020 = vrcp.f32 %v1239_v58  ;;  %v1572_v49 = vpop.xlane.xlu2 %1571 }
 0x428   :  { %2022 = vrcp.f32 %v1572_v49 }
 0x429   :  { %2024 = vrcp.f32 %v1575_v11 }
 0x42a   :  { %v2015_v26 = vpop.eup %2014 }
 0x42b   :  { %1831 = vmatmul.msk.bf16.vlgmr.msra.gmra.mxu0 %vm358_vm3, %v1256_v45  ;;  %v2017_v28 = vpop.eup %2016  ;;  %v1416_v10 = vmul.f32 %v2015_v26, %v2720_v38  ;;  %v1407_v38 = vpop.xlane.xlu0 %1406 }
 0x42c   :  { %v1415_v36 = vmul.f32 %v2017_v28, %v2667_v12  ;;  %v2019_v29 = vpop.eup %2018  ;;  %2026 = vrcp.f32 %v1407_v38 }
 0x42d   :  { %v1420_v20 = vpack.c.bf16 %v1416_v10, %v1416_v10  ;;  %v1454_v52 = vpop.permute.xlu1 %1453  ;;  %v2021_v14 = vpop.eup %2020  ;;  %v1246_v16 = vmul.f32 %v2019_v29, %v2717_v50  ;;  %2028 = vrcp.f32 %v1410_v54 }
 0x42e   :  { %v1419_v21 = vpack.c.bf16 %v1415_v36, %v1415_v36  ;;  %v1247_v3 = vmul.f32 %v2021_v14, %v2707_v7  ;;  %v2023_v61 = vpop.eup %2022 }
 0x42f   :  { %v1426_v41 = vunpack.c.l.b16 %v1420_v20  ;;  %v1250_v12 = vpack.c.bf16 %v1246_v16, %v1246_v16  ;;  %v1581_v51 = vpop.xlane.xlu2 %1580  ;;  %v2025_v15 = vpop.eup %2024  ;;  %v1586_v50 = vmul.f32 %v2023_v61, %v2726_v25 }
 0x430   :  { %v1425_v17 = vunpack.c.l.b16 %v1419_v21  ;;  %v1251_v63 = vpack.c.bf16 %v1247_v3, %v1247_v3  ;;  %v1587_v7 = vmul.f32 %v2025_v15, %v2700_v37  ;;  %2030 = vrcp.f32 %v1581_v51 }
 0x431   :  { %v1279_v46 = vunpack.c.l.b16 %v1250_v12  ;;  %v1590_v44 = vpack.c.bf16 %v1586_v50, %v1586_v50 }
 0x432   :  { %v1427_v56 = vpack.c.b16 %v1426_v41, %v1425_v17  ;;  %v1280_v31 = vunpack.c.l.b16 %v1251_v63  ;;  %v2027_v59 = vpop.eup %2026  ;;  %v1591_v53 = vpack.c.bf16 %v1587_v7, %v1587_v7 }
 0x433   :  { %1828 = vmatmul.msk.bf16.vlgmr.msrb.gmra.mxu1 %vm358_vm3, %v1110_v8  ;;  %v2029_v35 = vpop.eup %2028  ;;  %v1596_v25 = vunpack.c.l.b16 %v1590_v44  ;;  %v1417_v57 = vmul.f32 %v2027_v59, %v2729_v6 }
 0x434   :  { %1466 = vmatpush.bf16.msrb.mxu1 %v1454_v52  ;;  %v1281_v39 = vpack.c.b16 %v1280_v31, %v1279_v46  ;;  %v1418_v37 = vmul.f32 %v2029_v35, %v2686_v43  ;;  %v1597_v48 = vunpack.c.l.b16 %v1591_v53 }
 0x435   :  { %v1421_v5 = vpack.c.bf16 %v1417_v57, %v1417_v57 }
 0x436   :  { %v1598_v9 = vpack.c.b16 %v1597_v48, %v1596_v25  ;;  %v1422_v23 = vpack.c.bf16 %v1418_v37, %v1418_v37  ;;  %v2031_v33 = vpop.eup %2030 }
 0x437   :  { %v1625_v58 = vpop.permute.xlu2 %1624  ;;  %v1450_v18 = vunpack.c.l.b16 %v1421_v5  ;;  %v1589_v0 = vmul.f32 %v2031_v33, %v2736_v4 }
 0x438   :  { %v1451_v1 = vunpack.c.l.b16 %v1422_v23 }
 0x439   :  { %v1593_v22 = vpack.c.bf16 %v1589_v0, %v1589_v0 }
 0x43a   :  { %v588_v60 = vpop.f32.mrf.mxu0  ;;  %v1452_v19 = vpack.c.b16 %v1451_v1, %v1450_v18 }
 0x43b   :  { %v618_v30 = vpack.c.bf16 %v588_v60, %v588_v60  ;;  %1835 = vmatmul.msk.bf16.vlgmr.msrb.gmra.mxu0 %vm358_vm3, %v1427_v56  ;;  %v1622_v32 = vunpack.c.l.b16 %v1593_v22 }
 0x43d   :  { %626 = vrot.lane.b32.xlu0 %v618_v30, %s2188_s30 }
 0x43e   :  { %v1600_v24 = vpop.permute.xlu0 %1599 }
 0x43f   :  { %1612 = vmatpush.bf16.msra.mxu0 %v1600_v24 }
 0x442   :  { %v590_v42 = vpop.f32.mrf.mxu0 }
 0x443   :  { %v619_v2 = vpack.c.bf16 %v590_v42, %v590_v42  ;;  %1832 = vmatmul.msk.bf16.vlgmr.msra.gmra.mxu1 %vm358_vm3, %v1281_v39 }
 0x444   :  { %1637 = vmatpush.bf16.msra.mxu1 %v1625_v58 }
 0x445   :  { %628 = vrot.lane.b32.xlu0 %v619_v2, %s2188_s30 }
 0x44a   :  { %v613_v54 = vpop.f32.mrf.mxu1 }
 0x44b   :  { %v620_v40 = vpack.c.bf16 %v613_v54, %v613_v54  ;;  %1839 = vmatmul.msk.bf16.vlgmr.msra.gmra.mxu0 %vm358_vm3, %v1598_v9 }
 0x44d   :  { %630 = vrot.lane.b32.xlu1 %v620_v40, %s2188_s30 }
 0x452   :  { %v759_v47 = vpop.f32.mrf.mxu0  ;;  %v615_v26 = vpop.f32.mrf.mxu1 }
 0x453   :  { %v789_v6 = vpack.c.bf16 %v759_v47, %v759_v47  ;;  %1836 = vmatmul.msk.bf16.vlgmr.msrb.gmra.mxu1 %vm358_vm3, %v1452_v19  ;;  %v621_v55 = vpack.c.bf16 %v615_v26, %v615_v26 }
 0x455   :  { %797 = vrot.lane.b32.xlu0 %v789_v6, %s2206_s10 }
 0x458   :  { %v1578_v43 = vpop.xlane.xlu1 %1577 }
 0x459   :  { %2032 = vrcp.f32 %v1578_v43 }
 0x45a   :  { %v761_v27 = vpop.f32.mrf.mxu0 }
 0x45b   :  { %v790_v62 = vpack.c.bf16 %v761_v27, %v761_v27 }
 0x45d   :  { %799 = vrot.lane.b32.xlu2 %v790_v62, %s2206_s10 }
 0x45f   :  { %v2033_v45 = vpop.eup %2032 }
 0x460   :  { %v1588_v34 = vmul.f32 %v2033_v45, %v2762_v13 }
 0x462   :  { %v1592_v11 = vpack.c.bf16 %v1588_v34, %v1588_v34  ;;  %v930_v28 = vpop.f32.mrf.mxu0 }
 0x463   :  { %v960_v10 = vpack.c.bf16 %v930_v28, %v930_v28 }
 0x464   :  { %v1621_v36 = vunpack.c.l.b16 %v1592_v11 }
 0x465   :  { %968 = vrot.lane.b32.xlu0 %v960_v10, %s2202_s28  ;;  %632 = vrot.lane.b32.xlu2 %v621_v55, %s2188_s30  ;;  %v1880_v55 = vld [vmem:[#allocation11 + $0x18] sm:$0xff]  ;;  %v1879_v10 = vld [vmem:[#allocation11 + $0x10] sm:$0xff] }
 0x466   :  { %v1623_v49 = vpack.c.b16 %v1622_v32, %v1621_v36  ;;  %1729 = vmatpush.bf16.msrb.mxu2 %v1880_v55 }
 0x468   :  { %1840 = vmatmul.msk.bf16.vlgmr.msra.gmra.mxu1 %vm358_vm3, %v1623_v49 }
 0x46a   :  { %v932_v4 = vpop.f32.mrf.mxu0  ;;  %1730 = vmatpush.bf16.msrb.mxu2 %v1879_v10 }
 0x46b   :  { %v961_v8 = vpack.c.bf16 %v932_v4, %v932_v4  ;;  %v1878_v4 = vld [vmem:[#allocation11 + $0x8] sm:$0xff] }
 0x46d   :  { %970 = vrot.lane.b32.xlu2 %v961_v8, %s2202_s28  ;;  %v1877_v8 = vld [vmem:[#allocation11] sm:$0xff] }
 0x46e   :  { %1731 = vmatpush.bf16.msrb.mxu2 %v1878_v4 }
 0x472   :  { %1732 = vmatpush.bf16.msrb.mxu2 %v1877_v8 }
 0x490   :  { %v784_v20 = vpop.f32.mrf.mxu1 }
 0x491   :  { %v791_v29 = vpack.c.bf16 %v784_v20, %v784_v20 }
 0x493   :  { %801 = vrot.lane.b32.xlu0 %v791_v29, %s2206_s10 }
 0x498   :  { %v786_v13 = vpop.f32.mrf.mxu1  ;;  %v1101_v21 = vpop.f32.mrf.mxu0 }
 0x499   :  { %v792_v52 = vpack.c.bf16 %v786_v13, %v786_v13  ;;  %v1131_v14 = vpack.c.bf16 %v1101_v21, %v1101_v21 }
 0x49b   :  { %1139 = vrot.lane.b32.xlu0 %v1131_v14, %s2198_s24  ;;  %803 = vrot.lane.b32.xlu1 %v792_v52, %s2206_s10 }
 0x4a0   :  { %v955_v16 = vpop.f32.mrf.mxu1  ;;  %v1103_v41 = vpop.f32.mrf.mxu0 }
 0x4a1   :  { %v962_v38 = vpack.c.bf16 %v955_v16, %v955_v16  ;;  %v1132_v17 = vpack.c.bf16 %v1103_v41, %v1103_v41 }
 0x4a3   :  { %972 = vrot.lane.b32.xlu2 %v962_v38, %s2202_s28  ;;  %1141 = vrot.lane.b32.xlu1 %v1132_v17, %s2198_s24 }
 0x4a8   :  { %v957_v3 = vpop.f32.mrf.mxu1  ;;  %v1272_v12 = vpop.f32.mrf.mxu0 }
 0x4a9   :  { %v963_v56 = vpack.c.bf16 %v957_v3, %v957_v3  ;;  %v1302_v51 = vpack.c.bf16 %v1272_v12, %v1272_v12  ;;  %v1905_v3 = vld [vmem:[%s2880_s5] ss:$0 sm:$0xff] }
 0x4ab   :  { %974 = vrot.lane.b32.xlu0 %v963_v56, %s2202_s28  ;;  %1310 = vrot.lane.b32.xlu2 %v1302_v51, %s2196_s22 }
 0x4af   :  { %v627_v61 = vpop.permute.xlu0 %626 }
 0x4b0   :  { %639 = vst.msk [vmem:[#allocation2] sm:$0xf] %vm638_vm5, %v627_v61  ;;  %v1126_v60 = vpop.f32.mrf.mxu1  ;;  %v1274_v63 = vpop.f32.mrf.mxu0 }
 0x4b1   :  { %v1133_v30 = vpack.c.bf16 %v1126_v60, %v1126_v60  ;;  %v1303_v15 = vpack.c.bf16 %v1274_v63, %v1274_v63 }
 0x4b3   :  { %1312 = vrot.lane.b32.xlu0 %v1303_v15, %s2196_s22  ;;  %1143 = vrot.lane.b32.xlu1 %v1133_v30, %s2198_s24 }
 0x4b7   :  { %v629_v46 = vpop.permute.xlu0 %628  ;;  %v800_v50 = vpop.permute.xlu2 %799 }
 0x4b8   :  { %640 = vst.msk [vmem:[#allocation2 + $0x4] sm:$0xf] %vm638_vm5, %v629_v46  ;;  %v1128_v24 = vpop.f32.mrf.mxu1  ;;  %v1443_v7 = vpop.f32.mrf.mxu0 }
 0x4b9   :  { %811 = vst.msk [vmem:[#allocation2 + $0x4] sm:$0xf] %vm809_vm6, %v800_v50  ;;  %v1134_v31 = vpack.c.bf16 %v1128_v24, %v1128_v24  ;;  %v1473_v53 = vpack.c.bf16 %v1443_v7, %v1443_v7 }
 0x4bb   :  { %1145 = vrot.lane.b32.xlu2 %v1134_v31, %s2198_s24 }
 0x4bf   :  { %v631_v39 = vpop.permute.xlu1 %630  ;;  %v633_v44 = vpop.permute.xlu2 %632 }
 0x4c0   :  { %641 = vst.msk [vmem:[#allocation2 + $0x8] sm:$0xf] %vm638_vm5, %v631_v39  ;;  %v1297_v59 = vpop.f32.mrf.mxu1  ;;  %v1445_v42 = vpop.f32.mrf.mxu0 }
 0x4c1   :  { %642 = vst.msk [vmem:[#allocation2 + $0xc] sm:$0xf] %vm638_vm5, %v633_v44  ;;  %v1474_v58 = vpack.c.bf16 %v1445_v42, %v1445_v42  ;;  %v1304_v18 = vpack.c.bf16 %v1297_v59, %v1297_v59 }
 0x4c3   :  { %1483 = vrot.lane.b32.xlu0 %v1474_v58, %s2197_s23  ;;  %1481 = vrot.lane.b32.xlu2 %v1473_v53, %s2197_s23 }
 0x4c7   :  { %v798_v2 = vpop.permute.xlu0 %797  ;;  %v971_v35 = vpop.permute.xlu2 %970 }
 0x4c8   :  { %810 = vst.msk [vmem:[#allocation2] sm:$0xf] %vm809_vm6, %v798_v2  ;;  %v1299_v25 = vpop.f32.mrf.mxu1  ;;  %v1614_v57 = vpop.f32.mrf.mxu0 }
 0x4c9   :  { %982 = vst.msk [vmem:[#allocation2 + $0x4] sm:$0xf] %vm980_vm7, %v971_v35  ;;  %v1305_v37 = vpack.c.bf16 %v1299_v25, %v1299_v25  ;;  %v1644_v48 = vpack.c.bf16 %v1614_v57, %v1614_v57 }
 0x4cb   :  { %1316 = vrot.lane.b32.xlu1 %v1305_v37, %s2196_s22  ;;  %1652 = vrot.lane.b32.xlu2 %v1644_v48, %s2195_s4 }
 0x4d0   :  { %v1468_v9 = vpop.f32.mrf.mxu1  ;;  %v1616_v5 = vpop.f32.mrf.mxu0 }
 0x4d1   :  { %v1475_v54 = vpack.c.bf16 %v1468_v9, %v1468_v9  ;;  %v1645_v23 = vpack.c.bf16 %v1616_v5, %v1616_v5 }
 0x4d3   :  { %1485 = vrot.lane.b32.xlu2 %v1475_v54, %s2197_s23  ;;  %1654 = vrot.lane.b32.xlu0 %v1645_v23, %s2195_s4 }
 0x4d7   :  { %v969_v40 = vpop.permute.xlu0 %968 }
 0x4d8   :  { %981 = vst.msk [vmem:[#allocation2] sm:$0xf] %vm980_vm7, %v969_v40  ;;  %v1470_v1 = vpop.f32.mrf.mxu1 }
 0x4d9   :  { %v1476_v19 = vpack.c.bf16 %v1470_v1, %v1470_v1 }
 0x4db   :  { %1314 = vrot.lane.b32.xlu0 %v1304_v18, %s2196_s22 }
 0x4e3   :  { %1487 = vrot.lane.b32.xlu0 %v1476_v19, %s2197_s23 }
 0x4e5   :  { %v1639_v47 = vpop.f32.mrf.mxu1 }
 0x4e6   :  { %v1646_v6 = vpack.c.bf16 %v1639_v47, %v1639_v47 }
 0x4e8   :  { %1656 = vrot.lane.b32.xlu1 %v1646_v6, %s2195_s4 }
 0x4ed   :  { %v1641_v43 = vpop.f32.mrf.mxu1 }
 0x4ee   :  { %v1647_v33 = vpack.c.bf16 %v1641_v43, %v1641_v43 }
 0x4f0   :  { %1658 = vrot.lane.b32.xlu2 %v1647_v33, %s2195_s4 }
 0x4fd   :  { %v973_v27 = vpop.permute.xlu2 %972 }
 0x505   :  { %v802_v62 = vpop.permute.xlu0 %801  ;;  %v1311_v0 = vpop.permute.xlu2 %1310 }
 0x506   :  { %812 = vst.msk [vmem:[#allocation2 + $0x8] sm:$0xf] %vm809_vm6, %v802_v62 }
 0x507   :  { %983 = vst.msk [vmem:[#allocation2 + $0x8] sm:$0xf] %vm980_vm7, %v973_v27 }
 0x50d   :  { %v1140_v45 = vpop.permute.xlu0 %1139  ;;  %v804_v22 = vpop.permute.xlu1 %803 }
 0x50e   :  { %1152 = vst.msk [vmem:[#allocation2] sm:$0xf] %vm1151_vm8, %v1140_v45 }
 0x50f   :  { %813 = vst.msk [vmem:[#allocation2 + $0xc] sm:$0xf] %vm809_vm6, %v804_v22 }
 0x510   :  { %1323 = vst.msk [vmem:[#allocation2] sm:$0xf] %vm1322_vm9, %v1311_v0 }
 0x515   :  { %v1142_v26 = vpop.permute.xlu1 %1141  ;;  %v1146_v34 = vpop.permute.xlu2 %1145 }
 0x516   :  { %1153 = vst.msk [vmem:[#allocation2 + $0x4] sm:$0xf] %vm1151_vm8, %v1142_v26 }
 0x51d   :  { %v975_v11 = vpop.permute.xlu0 %974  ;;  %v1482_v28 = vpop.permute.xlu2 %1481 }
 0x51e   :  { %984 = vst.msk [vmem:[#allocation2 + $0xc] sm:$0xf] %vm980_vm7, %v975_v11 }
 0x51f   :  { %1155 = vst.msk [vmem:[#allocation2 + $0xc] sm:$0xf] %vm1151_vm8, %v1146_v34 }
 0x520   :  { %1494 = vst.msk [vmem:[#allocation2] sm:$0xf] %vm1493_vm10, %v1482_v28 }
 0x525   :  { %v1313_v32 = vpop.permute.xlu0 %1312  ;;  %v1144_v36 = vpop.permute.xlu1 %1143 }
 0x526   :  { %1324 = vst.msk [vmem:[#allocation2 + $0x4] sm:$0xf] %vm1322_vm9, %v1313_v32  ;;  %v1653_v49 = vpop.permute.xlu2 %1652 }
 0x527   :  { %1154 = vst.msk [vmem:[#allocation2 + $0x8] sm:$0xf] %vm1151_vm8, %v1144_v36 }
 0x528   :  { %1665 = vst.msk [vmem:[#allocation2] sm:$0xf] %vm1664_vm11, %v1653_v49 }
 0x52e   :  { %v1486_v14 = vpop.permute.xlu2 %1485 }
 0x535   :  { %v1484_v20 = vpop.permute.xlu0 %1483 }
 0x536   :  { %1495 = vst.msk [vmem:[#allocation2 + $0x4] sm:$0xf] %vm1493_vm10, %v1484_v20 }
 0x53d   :  { %v1317_v29 = vpop.permute.xlu1 %1316 }
 0x53e   :  { %1326 = vst.msk [vmem:[#allocation2 + $0xc] sm:$0xf] %vm1322_vm9, %v1317_v29 }
 0x545   :  { %v1655_v13 = vpop.permute.xlu0 %1654 }
 0x546   :  { %1666 = vst.msk [vmem:[#allocation2 + $0x4] sm:$0xf] %vm1664_vm11, %v1655_v13 }
 0x54a   :  { %v1659_v41 = vpop.permute.xlu2 %1658 }
 0x54d   :  { %v1315_v21 = vpop.permute.xlu0 %1314  ;;  %v1875_v52 = vld [vmem:[#allocation2] sm:$0xff] }
 0x54e   :  { %1325 = vst.msk [vmem:[#allocation2 + $0x8] sm:$0xf] %vm1322_vm9, %v1315_v21  ;;  %1865 = vmatmul.msk.bf16.vlgmr.msrb.gmra.mxu2 %vm153_vm0, %v1875_v52 }
 0x54f   :  { %1496 = vst.msk [vmem:[#allocation2 + $0x8] sm:$0xf] %vm1493_vm10, %v1486_v14 }
 0x555   :  { %v1488_v16 = vpop.permute.xlu0 %1487 }
 0x556   :  { %1497 = vst.msk [vmem:[#allocation2 + $0xc] sm:$0xf] %vm1493_vm10, %v1488_v16 }
 0x557   :  { %1668 = vst.msk [vmem:[#allocation2 + $0xc] sm:$0xf] %vm1664_vm11, %v1659_v41 }
 0x55a   :  { %v1657_v38 = vpop.permute.xlu1 %1656 }
 0x55b   :  { %1667 = vst.msk [vmem:[#allocation2 + $0x8] sm:$0xf] %vm1664_vm11, %v1657_v38 }
 0x562   :  { %v1876_v17 = vld [vmem:[#allocation2 + $0x8] sm:$0xff] }
 0x563   :  { %1866 = vmatmul.msk.bf16.gmra.mxu2 %vm153_vm0, %v1876_v17 }
 0x5d1   :  { %v1734_v12 = vpop.f32.mrf.mxu2 }
 0x5d2   :  { %v1735_v56 = vadd.f32 %v1905_v3, %v1734_v12 }
 0x5d4   :  { %1744 = vst.msk [vmem:[#allocation12] sm:$0xff] %vm153_vm0, %v1735_v56 }
 0x5d9   :  { %v1736_v51 = vpop.f32.mrf.mxu2 }
 0x5da   :  { %v1737_v61 = vadd.f32 %v1905_v3, %v1736_v51 }
 0x5dc   :  { %1745 = vst.msk [vmem:[#allocation12 + $0x8] sm:$0xff] %vm153_vm0, %v1737_v61 }
 0x5e6   :  { %v1739_v60 = vpop.f32.mrf.mxu2 }
 0x5e7   :  { %v1740_v63 = vadd.f32 %v1905_v3, %v1739_v60 }
 0x5e9   :  { %1746 = vst.msk [vmem:[#allocation12 + $0x10] sm:$0xff] %vm153_vm0, %v1740_v63 }
 0x5ee   :  { %v1741_v30 = vpop.f32.mrf.mxu2 }
 0x5ef   :  { %v1742_v15 = vadd.f32 %v1905_v3, %v1741_v30 }
 0x5f1   :  { %1747 = vst.msk [vmem:[#allocation12 + $0x18] sm:$0xff] %vm153_vm0, %v1742_v15 }
 0x5f2   :  { %1760 = dma.vmem_to_hbm [thread:$0]  %s1753_s13, 512, %s1755_s16, [#allocation5], %s2187_s29, %s2187_s29, %s2188_s30  }
 0x5f3   :  { %2184 = dma.done.wait [#allocation5], 512  }
 0x5f4   :  { %2185 = vsyncadd [#allocation5], 4294966784 }
 0x5f5   :  { %1765 = vsyncpa [#allocation4], 1 }
 0x5f6   :  { %1766 = vsyncpa [#allocation7], 1 }
 0x5f7   :  { %1767 = vsyncpa [#allocation10], 1 }
 0x5f8   :  { %1768 = vsyncpa [#allocation5], 1 }

</bundles_post_ra>
